<compile_context>
chip_gen: v7x
topology: tpu7x:2x2x1
jax: 0.10.0
libtpu: 0.0.40
codegen_flags: <defaults>
</compile_context>

<pallas_src>
import jax
import jax.numpy as jnp
from jax import lax
from jax.experimental import pallas as pl
from jax.experimental.pallas import tpu as pltpu

IN_DIM = 13
HID = 512
OUT_DIM = 1


def _mlp_kernel(x_ref, w1_ref, w2_ref, b2_ref, w3_ref, b3_ref, o_ref):
    """Fused 3-layer MLP on one (batch_tile, IN_DIM+1) input tile.

    x_ref  : (T, 14)   f32   (col 13 is the ones column -> folds b1)
    w1_ref : (512, 14) bf16  (col 13 is b1)
    w2_ref : (512, 512) bf16,  b2_ref: (512, 1) f32
    w3_ref : (1, 512)  f32,    b3_ref: (1, 1)  f32
    o_ref  : (1, T)    f32
    """
    x = x_ref[...].astype(jnp.bfloat16)                                  # (T, 14)

    # Layer 1: (512, 14) . (T, 14)^T -> (512, T); bias folded via ones column.
    h = lax.dot_general(
        w1_ref[...], x,
        dimension_numbers=(((1,), (1,)), ((), ())),
        preferred_element_type=jnp.float32)                              # (512, T) f32
    h = jnp.maximum(h, 0.0)                                              # ReLU (Dropout=id)

    # Layer 2: (512, 512) @ (512, T) -> (512, T)
    h = jnp.dot(w2_ref[...], h.astype(jnp.bfloat16),
                preferred_element_type=jnp.float32)
    h = jnp.maximum(h + b2_ref[...], 0.0)                                # ReLU (Dropout=id)

    # Layer 3: (1, 512) @ (512, T) -> lane-dense (1, T); input kept in f32.
    z = jnp.dot(w3_ref[...], h, preferred_element_type=jnp.float32)
    o_ref[...] = jax.nn.sigmoid(z + b3_ref[...]).astype(o_ref.dtype)


def _round_up(v, m):
    return ((v + m - 1) // m) * m


def _pick_batch_tile(B, max_tile=2048):
    """Large enough to amortize ~0.35us/step grid overhead; small enough that
    the grid has >= 2 steps for large B so the 'parallel' batch axis shards
    across both TensorCores on v7x (no-op on v5e/v6e)."""
    if B <= 256:
        return max(_round_up(B, 8), 8)
    return min(max_tile, _round_up(pl.cdiv(B, 2), 128))


def mlp_forward(x, params, *, max_batch_tile=2048):
    """x: (B, 13) float. Returns (B, 1) float32 probabilities."""
    w1, b1, w2, b2, w3, b3 = params          # PyTorch layout: w = (F_out, F_in), b = (F_out,)
    B = x.shape[0]
    tile = _pick_batch_tile(B, max_batch_tile)
    n_tiles = pl.cdiv(B, tile)
    B_pad = n_tiles * tile

    # Single pad op: rows -> tile multiple, plus a ones column (bias fold for
    # layer 1).  Padded rows also see 1.0 — harmless, they are sliced off.
    x_aug = jnp.pad(x.astype(jnp.float32), ((0, B_pad - B), (0, 1)),
                    constant_values=1.0)                                  # (B_pad, 14)

    # Fold b1 into W1 as its 14th column (K=13 already pads to MXU depth).
    w1_aug = jnp.concatenate([w1, b1.reshape(HID, 1)], axis=1).astype(jnp.bfloat16)

    const = lambda i: (0, 0)                 # resident weights: never re-fetched

    out = pl.pallas_call(
        _mlp_kernel,
        out_shape=jax.ShapeDtypeStruct((1, B_pad), jnp.float32),
        grid_spec=pl.GridSpec(
            grid=(n_tiles,),
            in_specs=[
                pl.BlockSpec((tile, IN_DIM + 1), lambda i: (i, 0)),       # x tile
                pl.BlockSpec((HID, IN_DIM + 1), const),                   # W1 | b1
                pl.BlockSpec((HID, HID), const),                          # W2
                pl.BlockSpec((HID, 1), const),                            # b2
                pl.BlockSpec((OUT_DIM, HID), const),                      # W3
                pl.BlockSpec((OUT_DIM, 1), const),                        # b3
            ],
            out_specs=pl.BlockSpec((1, tile), lambda i: (0, i)),
        ),
        compiler_params=pltpu.CompilerParams(
            dimension_semantics=("parallel",),        # megacore-shard batch on v7x
            vmem_limit_bytes=40 * 1024 * 1024,        # covers T=2048 even on v5e
        ),
    )(
        x_aug,
        w1_aug,
        w2.astype(jnp.bfloat16),
        b2.reshape(HID, 1).astype(jnp.float32),
        w3.astype(jnp.float32),
        b3.reshape(OUT_DIM, 1).astype(jnp.float32),
    )
    return out[0, :B].reshape(B, OUT_DIM)


def init_params(key):
    """Matches initialize_weights: Linear w ~ N(0, 0.18), b = 0 (PyTorch layout)."""
    k1, k2, k3 = jax.random.split(key, 3)
    w1 = jax.random.normal(k1, (HID, IN_DIM), jnp.float32) * 0.18
    b1 = jnp.zeros((HID,), jnp.float32)
    w2 = jax.random.normal(k2, (HID, HID), jnp.float32) * 0.18
    b2 = jnp.zeros((HID,), jnp.float32)
    w3 = jax.random.normal(k3, (OUT_DIM, HID), jnp.float32) * 0.18
    b3 = jnp.zeros((OUT_DIM,), jnp.float32)
    return (w1, b1, w2, b2, w3, b3)


def reference_forward(x, params):
    """Pure-JAX reference for correctness checking (eval-mode Dropout = identity)."""
    w1, b1, w2, b2, w3, b3 = params
    h = jnp.maximum(x @ w1.T + b1, 0.0)
    h = jnp.maximum(h @ w2.T + b2, 0.0)
    return jax.nn.sigmoid(h @ w3.T + b3)


if __name__ == "__main__":
    key = jax.random.PRNGKey(0)
    kx, kx2, kp, kb = jax.random.split(key, 4)

    params0 = init_params(kp)

    # Non-zero biases too, so the b1-fold / b2 / b3 paths are actually exercised.
    w1, b1, w2, b2, w3, b3 = params0
    kb1, kb2, kb3 = jax.random.split(kb, 3)
    params1 = (
        w1, 0.1 * jax.random.normal(kb1, b1.shape, jnp.float32),
        w2, 0.1 * jax.random.normal(kb2, b2.shape, jnp.float32),
        w3, 0.1 * jax.random.normal(kb3, b3.shape, jnp.float32),
    )

    # Small batch (single tile) and a larger batch (multi-tile grid, padded rows).
    x_small = jax.random.normal(kx, (8, IN_DIM), jnp.float32)
    x_big = jax.random.normal(kx2, (384, IN_DIM), jnp.float32)

    for x, params in ((x_small, params0), (x_small, params1), (x_big, params1)):
        out = jax.block_until_ready(mlp_forward(x, params))
        ref = reference_forward(x, params)
        assert out.shape == (x.shape[0], OUT_DIM)
        # bf16 matmuls with f32 accumulation -> looser tolerance vs reference.
        assert jnp.allclose(out, ref, atol=2e-2, rtol=2e-2), "mismatch vs JAX reference"
        assert bool(jnp.all(jnp.isfinite(out)))

    # TODO(synk): nn.Dropout is treated as identity (eval mode); training-mode
    # stochastic dropout would use pltpu.prng_seed / pltpu.stateful_bernoulli.
    print("KERNEL_OK")
</pallas_src>

<mosaic_0001>
module attributes {stable_mosaic.version = 11 : i64} {
  func.func @_mlp_kernel(%arg0: i32, %arg1: memref<8x14xf32, #tpu.memory_space<vmem>>, %arg2: memref<512x14xbf16, #tpu.memory_space<vmem>>, %arg3: memref<512x512xbf16, #tpu.memory_space<vmem>>, %arg4: memref<512x1xf32, #tpu.memory_space<vmem>>, %arg5: memref<1x512xf32, #tpu.memory_space<vmem>>, %arg6: memref<1x1xf32, #tpu.memory_space<vmem>>, %arg7: memref<1x8xf32, #tpu.memory_space<vmem>>) attributes {dimension_semantics = [#tpu.dimension_semantics<parallel>], iteration_bounds = array<i64: 1>, scalar_prefetch = 0 : i64, scratch_operands = 0 : i64, tpu.core_type = #tpu.core_type<tc>, window_params = [{transform_indices = @transform_0, window_bounds = array<i64: 8, 14>}, {pipeline_mode = #tpu.pipeline_mode<synchronous>, transform_indices = @transform_1, window_bounds = array<i64: 512, 14>}, {pipeline_mode = #tpu.pipeline_mode<synchronous>, transform_indices = @transform_2, window_bounds = array<i64: 512, 512>}, {pipeline_mode = #tpu.pipeline_mode<synchronous>, transform_indices = @transform_3, window_bounds = array<i64: 512, 1>}, {pipeline_mode = #tpu.pipeline_mode<synchronous>, transform_indices = @transform_4, window_bounds = array<i64: 1, 512>}, {pipeline_mode = #tpu.pipeline_mode<synchronous>, transform_indices = @transform_5, window_bounds = array<i64: 1, 1>}, {transform_indices = @transform_6, window_bounds = array<i64: 1, 8>}]} {
    %c0 = arith.constant 0 : index
    %c0_0 = arith.constant 0 : index
    %0 = vector.load %arg1[%c0, %c0_0] : memref<8x14xf32, #tpu.memory_space<vmem>>, vector<8x14xf32>
    %1 = arith.truncf %0 : vector<8x14xf32> to vector<8x14xbf16>
    %c0_1 = arith.constant 0 : index
    %c0_2 = arith.constant 0 : index
    %2 = vector.load %arg2[%c0_1, %c0_2] : memref<512x14xbf16, #tpu.memory_space<vmem>>, vector<512x14xbf16>
    %cst = arith.constant dense<0.000000e+00> : vector<512x8xf32>
    %3 = tpu.matmul %2, %1, %cst {dimension_numbers = #tpu.dot_dimension_numbers<[1], [1], [0], [0], [0, 0, 1, 0], [], []>} : vector<512x14xbf16>, vector<8x14xbf16>, vector<512x8xf32> -> vector<512x8xf32>
    %cst_3 = arith.constant 0.000000e+00 : f32
    %4 = vector.broadcast %cst_3 : f32 to vector<512x8xf32>
    %5 = arith.maximumf %3, %4 : vector<512x8xf32>
    %c0_4 = arith.constant 0 : index
    %c0_5 = arith.constant 0 : index
    %6 = vector.load %arg3[%c0_4, %c0_5] : memref<512x512xbf16, #tpu.memory_space<vmem>>, vector<512x512xbf16>
    %7 = arith.truncf %5 : vector<512x8xf32> to vector<512x8xbf16>
    %cst_6 = arith.constant dense<0.000000e+00> : vector<512x8xf32>
    %8 = tpu.matmul %6, %7, %cst_6 {dimension_numbers = #tpu.dot_dimension_numbers<[1], [0], [0], [1], [0, 0, 1, 1], [], []>} : vector<512x512xbf16>, vector<512x8xbf16>, vector<512x8xf32> -> vector<512x8xf32>
    %c0_7 = arith.constant 0 : index
    %c0_8 = arith.constant 0 : index
    %9 = vector.load %arg4[%c0_7, %c0_8] : memref<512x1xf32, #tpu.memory_space<vmem>>, vector<512x1xf32>
    %10 = vector.broadcast %9 : vector<512x1xf32> to vector<512x8xf32>
    %11 = arith.addf %8, %10 : vector<512x8xf32>
    %cst_9 = arith.constant 0.000000e+00 : f32
    %12 = vector.broadcast %cst_9 : f32 to vector<512x8xf32>
    %13 = arith.maximumf %11, %12 : vector<512x8xf32>
    %c0_10 = arith.constant 0 : index
    %c0_11 = arith.constant 0 : index
    %14 = vector.load %arg5[%c0_10, %c0_11] : memref<1x512xf32, #tpu.memory_space<vmem>>, vector<1x512xf32>
    %cst_12 = arith.constant dense<0.000000e+00> : vector<1x8xf32>
    %15 = tpu.matmul %14, %13, %cst_12 {dimension_numbers = #tpu.dot_dimension_numbers<[1], [0], [0], [1], [0, 0, 1, 1], [], []>} : vector<1x512xf32>, vector<512x8xf32>, vector<1x8xf32> -> vector<1x8xf32>
    %c0_13 = arith.constant 0 : index
    %c0_14 = arith.constant 0 : index
    %16 = vector.load %arg6[%c0_13, %c0_14] : memref<1x1xf32, #tpu.memory_space<vmem>>, vector<1x1xf32>
    %17 = vector.broadcast %16 : vector<1x1xf32> to vector<1x8xf32>
    %18 = arith.addf %15, %17 : vector<1x8xf32>
    %19 = arith.negf %18 : vector<1x8xf32>
    %20 = math.exp %19 : vector<1x8xf32>
    %cst_15 = arith.constant 1.000000e+00 : f32
    %21 = vector.broadcast %cst_15 : f32 to vector<1x8xf32>
    %22 = arith.addf %21, %20 : vector<1x8xf32>
    %23 = arith.divf %21, %22 : vector<1x8xf32>
    %c0_16 = arith.constant 0 : index
    %c0_17 = arith.constant 0 : index
    %24 = vector.load %arg7[%c0_16, %c0_17] : memref<1x8xf32, #tpu.memory_space<vmem>>, vector<1x8xf32>
    tpu.vector_store %arg7[%c0_16, %c0_17], %23 {strides = array<i32>} : memref<1x8xf32, #tpu.memory_space<vmem>>, vector<1x8xf32>,
    return
  }
  func.func @transform_0(%arg0: i32) -> (i32, i32) {
    %c0_i32 = arith.constant 0 : i32
    %c0_i32_0 = arith.constant 0 : i32
    return %arg0, %c0_i32 : i32, i32
  }
  func.func @transform_1(%arg0: i32) -> (i32, i32) {
    %c0_i32 = arith.constant 0 : i32
    %c0_i32_0 = arith.constant 0 : i32
    %c0_i32_1 = arith.constant 0 : i32
    return %c0_i32, %c0_i32_0 : i32, i32
  }
  func.func @transform_2(%arg0: i32) -> (i32, i32) {
    %c0_i32 = arith.constant 0 : i32
    %c0_i32_0 = arith.constant 0 : i32
    %c0_i32_1 = arith.constant 0 : i32
    return %c0_i32, %c0_i32_0 : i32, i32
  }
  func.func @transform_3(%arg0: i32) -> (i32, i32) {
    %c0_i32 = arith.constant 0 : i32
    %c0_i32_0 = arith.constant 0 : i32
    %c0_i32_1 = arith.constant 0 : i32
    return %c0_i32, %c0_i32_0 : i32, i32
  }
  func.func @transform_4(%arg0: i32) -> (i32, i32) {
    %c0_i32 = arith.constant 0 : i32
    %c0_i32_0 = arith.constant 0 : i32
    %c0_i32_1 = arith.constant 0 : i32
    return %c0_i32, %c0_i32_0 : i32, i32
  }
  func.func @transform_5(%arg0: i32) -> (i32, i32) {
    %c0_i32 = arith.constant 0 : i32
    %c0_i32_0 = arith.constant 0 : i32
    %c0_i32_1 = arith.constant 0 : i32
    return %c0_i32, %c0_i32_0 : i32, i32
  }
  func.func @transform_6(%arg0: i32) -> (i32, i32) {
    %c0_i32 = arith.constant 0 : i32
    %c0_i32_0 = arith.constant 0 : i32
    return %c0_i32, %arg0 : i32, i32
  }
}

</mosaic_0001>

<bundles_post_ra>
// kernel: tpu_custom_call.1
= control target key start
LH: loop header
LB: loop body
LE: loop exit
PB: predicated region body
PF: predicated region fallthrough
CT: control target
= control target key end

     0   :  { %s4416_s0 = inlined_call_operand.vmem [shape: f32[8,14], index: 0, kind: input, shape index: {}]   ;;  %s4417_s1 = inlined_call_operand.vmem [shape: bf16[512,14], index: 1, kind: input, shape index: {}]   ;;  %s4418_s2 = inlined_call_operand.hbm [shape: bf16[512,512], index: 2, kind: input, shape index: {}]   ;;  %s4419_s3 = inlined_call_operand.vmem [shape: f32[512,1], index: 3, kind: input, shape index: {}]   ;;  %s4420_s4 = inlined_call_operand.vmem [shape: f32[1,512], index: 4, kind: input, shape index: {}]   ;;  %s4421_s5 = inlined_call_operand.<no memory space> [shape: f32[1,1], index: 5, kind: input, shape index: {}]   ;;  %s4422_s6 = inlined_call_operand.hbm [shape: f32[1,8], index: 6, kind: output, shape index: {}]  }
   0x1   :  { %v11_v0 = vstv %s4421_s5 }
   0x2   :  { %12 = vst [vmem:[#allocation2] sm:$0x1] %v11_v0 }
   0x3   :  { %13 = vsyncpa [#allocation4], 0 }
   0x4   :  { %14 = vsyncpa [#allocation5], 0  ;;  %s3625_s23 = smov [#allocation3]   ;;  %s3577_s27 = scalar_lea.hbm %s4418_s2, 16384 }
   0x5   :  { %s24_s24 = sshll.u32 %s3625_s23, 4  ;;  %p3578_p0 = scmp.ne.s32.totalorder %s4418_s2, %s3577_s27  ;;  %s25_s24 = int_to_ptr.vmem [resolvable:$true] %s24_s24 }
   0x6   :  { %p3581_p1 = scmp.lt.u32.totalorder %s3577_s27, %s4418_s2 }
   0x8   :  { %p3583_p2 = pnand %p3581_p1, %p3578_p0 }
   0xa   :  { %3586 = shalt.err (!%p3583_p2)
}
   0xb   :  { %s3587_s5 = scalar_lea.vmem %s25_s24, 16384  ;;  %p3592_p4 = scmp.lt.s32.totalorder %s25_s24, %s25_s24 }
   0xc   :  { %p3588_p3 = scmp.ne.s32.totalorder %s25_s24, %s3587_s5  ;;  %p3593_p5 = scmp.lt.s32.totalorder %s3587_s5, %s3587_s5 }
   0xe   :  { %p3594_p6 = por %p3593_p5, %p3592_p4 }
  0x10   :  { %p3595_p7 = pnand %p3594_p6, %p3588_p3 }
  0x12   :  { %3598 = shalt.err (!%p3595_p7)
}
  0x13   :  { %s3626_s8 = smov 256   ;;  %s3627_s9 = smov 16  }
  0x14   :  { %30 = dma.hbm_to_vmem [thread:$0]  %s4418_s2, 16384, %s25_s24, [#allocation4], %s3626_s8, %s3626_s8, %s3627_s9  }
  0x15   :  { %3621 = dma.done.wait [#allocation4], 16384  }
  0x16   :  { %3622 = vsyncadd [#allocation4], 4294950912  ;;  %v41_v1 = vld [vmem:[%s4416_s0] sm:$0xff]  ;;  %vm267_vm0 = vcmask 113664   ;;  %v3350_v5 = vld [vmem:[%s4417_s1 + $0x8] sm:$0xff]   ;;  %v3628_v29 = vmov 0  }
  0x17   :  { %v42_v2 = vpack.c.bf16 %v41_v1, %v41_v1  ;;  %v3349_v3 = vld [vmem:[%s4417_s1] sm:$0xff]   ;;  %v3351_v6 = vld [vmem:[%s4417_s1 + $0x10] sm:$0xff]   ;;  %v3352_v7 = vld [vmem:[%s4417_s1 + $0x18] sm:$0xff]   ;;  %1904 = vmatprep.subr.bf16.mxu1 %v3628_v29  ;;  %3347 = vset.pattern.permute.xlu0 %v3628_v29  ;;  %vm2724_vm1 = vcmask 57344  }
  0x18   :  { %3039 = vmatprep.mubr.msk.bf16.mxu0 %vm267_vm0, %v3349_v3  ;;  %v3353_v8 = vld [vmem:[%s4417_s1 + $0x20] sm:$0xff]   ;;  %v3354_v9 = vld [vmem:[%s4417_s1 + $0x28] sm:$0xff]   ;;  %v3355_v10 = vld [vmem:[%s4417_s1 + $0x30] sm:$0xff]   ;;  %3348 = vset.pattern.permute.xlu1 %v3628_v29 }
  0x19   :  { %3341 = vmatprep.subr.msk.bf16.mxu0 %vm267_vm0, %v42_v2  ;;  %v365_v4 = vsel %vm267_vm0, %v42_v2, 0  ;;  %v3356_v11 = vld [vmem:[%s4417_s1 + $0x38] sm:$0xff]   ;;  %v3357_v12 = vld [vmem:[%s4417_s1 + $0x40] sm:$0xff]   ;;  %v3358_v13 = vld [vmem:[%s4417_s1 + $0x48] sm:$0xff]  }
  0x1a   :  { %3038 = vmatpush3.bf16.xpose.msra.mxu0 %v365_v4  ;;  %v3359_v14 = vld [vmem:[%s4417_s1 + $0x50] sm:$0xff]   ;;  %v3360_v15 = vld [vmem:[%s4417_s1 + $0x58] sm:$0xff]   ;;  %v3361_v16 = vld [vmem:[%s4417_s1 + $0x60] sm:$0xff]  }
  0x1b   :  { %v3362_v17 = vld [vmem:[%s4417_s1 + $0x68] sm:$0xff]   ;;  %v3363_v18 = vld [vmem:[%s4417_s1 + $0x70] sm:$0xff]   ;;  %v3364_v19 = vld [vmem:[%s4417_s1 + $0x78] sm:$0xff]   ;;  %2193 = vmatprep.subr.bf16.mxu0 %v3628_v29 }
  0x1c   :  { %v3365_v20 = vld [vmem:[%s4417_s1 + $0x80] sm:$0xff]   ;;  %v3366_v21 = vld [vmem:[%s4417_s1 + $0x88] sm:$0xff]   ;;  %v3367_v22 = vld [vmem:[%s4417_s1 + $0x90] sm:$0xff]  }
  0x1d   :  { %v3368_v23 = vld [vmem:[%s4417_s1 + $0x98] sm:$0xff]   ;;  %v3369_v24 = vld [vmem:[%s4417_s1 + $0xa0] sm:$0xff]   ;;  %v3370_v25 = vld [vmem:[%s4417_s1 + $0xa8] sm:$0xff]  }
  0x1e   :  { %v3371_v26 = vld [vmem:[%s4417_s1 + $0xb0] sm:$0xff]   ;;  %v3372_v27 = vld [vmem:[%s4417_s1 + $0xb8] sm:$0xff]   ;;  %v3373_v28 = vld [vmem:[%s4417_s1 + $0xc0] sm:$0xff]  }
  0x1f   :  { %v3374_v30 = vld [vmem:[%s4417_s1 + $0xc8] sm:$0xff]   ;;  %v3375_v31 = vld [vmem:[%s4417_s1 + $0xd0] sm:$0xff]   ;;  %v3376_v32 = vld [vmem:[%s4417_s1 + $0xd8] sm:$0xff]  }
  0x20   :  { %v3377_v33 = vld [vmem:[%s4417_s1 + $0xe0] sm:$0xff]   ;;  %v3378_v34 = vld [vmem:[%s4417_s1 + $0xe8] sm:$0xff]   ;;  %v3379_v35 = vld [vmem:[%s4417_s1 + $0xf0] sm:$0xff]  }
  0x21   :  { %3040 = vmatmul.mubr.msk.bf16.vlgmr.msra.gmra.mrb[0].mxu0 %vm267_vm0, %v3350_v5  ;;  %v3380_v36 = vld [vmem:[%s4417_s1 + $0xf8] sm:$0xff]   ;;  %v896_v60 = vld [vmem:[%s4419_s3 + $0x80] sm:$0xff] }
  0x22   :  { %3043 = vmatprep.mubr.msk.bf16.mxu0 %vm267_vm0, %v3351_v6  ;;  %v3383_v37 = vld [vmem:[#allocation3 + $0x4] ss:$16 sps:$4 sm:$0xff]   ;;  %v3409_v47 = vld [vmem:[#allocation3 + $0xc] ss:$16 sps:$4 sm:$0xff]   ;;  %1026 = vperm.xlu0 %3347, %v896_v60  }
  0x23   :  { %1936 = vmatprep.mubr.bf16.mxu1 %v3383_v37  ;;  %v897_v6 = vld [vmem:[%s4419_s3 + $0x88] sm:$0xff]  ;;  %v887_v60 = vld [vmem:[%s4419_s3 + $0x38] sm:$0xff] }
  0x26   :  { %1031 = vperm.xlu0 %3347, %v897_v6  }
  0x29   :  { %3044 = vmatmul.mubr.msk.bf16.gmra.mrb[4].mxu0 %vm267_vm0, %v3352_v7  ;;  %v880_v7 = vld [vmem:[%s4419_s3] sm:$0xff] }
  0x2a   :  { %3047 = vmatprep.mubr.msk.bf16.mxu0 %vm267_vm0, %v3353_v8  ;;  %946 = vperm.xlu1 %3348, %v880_v7  }
  0x31   :  { %3048 = vmatmul.mubr.msk.bf16.gmra.mrb[8].mxu0 %vm267_vm0, %v3354_v9 }
  0x32   :  { %3051 = vmatprep.mubr.msk.bf16.mxu0 %vm267_vm0, %v3355_v10  ;;  %v898_v10 = vld [vmem:[%s4419_s3 + $0x90] sm:$0xff] }
  0x33   :  { %1036 = vperm.xlu0 %3347, %v898_v10   ;;  %v889_v10 = vld [vmem:[%s4419_s3 + $0x48] sm:$0xff] }
  0x39   :  { %3052 = vmatmul.mubr.msk.bf16.gmra.mrb[12].mxu0 %vm267_vm0, %v3356_v11 }
  0x3a   :  { %3055 = vmatprep.mubr.msk.bf16.mxu0 %vm267_vm0, %v3357_v12 }
  0x41   :  { %3056 = vmatmul.mubr.msk.bf16.gmra.mrb[16].mxu0 %vm267_vm0, %v3358_v13 }
  0x42   :  { %3059 = vmatprep.mubr.msk.bf16.mxu0 %vm267_vm0, %v3359_v14 }
  0x49   :  { %3060 = vmatmul.mubr.msk.bf16.gmra.mrb[20].mxu0 %vm267_vm0, %v3360_v15 }
  0x4a   :  { %3063 = vmatprep.mubr.msk.bf16.mxu0 %vm267_vm0, %v3361_v16 }
  0x51   :  { %3064 = vmatmul.mubr.msk.bf16.gmra.mrb[24].mxu0 %vm267_vm0, %v3362_v17  ;;  %v881_v17 = vld [vmem:[%s4419_s3 + $0x8] sm:$0xff] }
  0x52   :  { %3067 = vmatprep.mubr.msk.bf16.mxu0 %vm267_vm0, %v3363_v18  ;;  %951 = vperm.xlu1 %3348, %v881_v17  }
  0x59   :  { %3068 = vmatmul.mubr.msk.bf16.gmra.mrb[28].mxu0 %vm267_vm0, %v3364_v19 }
  0x5a   :  { %3071 = vmatprep.mubr.msk.bf16.mxu0 %vm267_vm0, %v3365_v20  ;;  %v882_v20 = vld [vmem:[%s4419_s3 + $0x10] sm:$0xff] }
  0x5b   :  { %956 = vperm.xlu0 %3347, %v882_v20  }
  0x61   :  { %3072 = vmatmul.mubr.msk.bf16.gmra.mrb[32].mxu0 %vm267_vm0, %v3366_v21  ;;  %v899_v21 = vld [vmem:[%s4419_s3 + $0x98] sm:$0xff] }
  0x62   :  { %3075 = vmatprep.mubr.msk.bf16.mxu0 %vm267_vm0, %v3367_v22  ;;  %1041 = vperm.xlu1 %3348, %v899_v21  }
  0x69   :  { %3076 = vmatmul.mubr.msk.bf16.gmra.mrb[36].mxu0 %vm267_vm0, %v3368_v23 }
  0x6a   :  { %3079 = vmatprep.mubr.msk.bf16.mxu0 %vm267_vm0, %v3369_v24  ;;  %v900_v24 = vld [vmem:[%s4419_s3 + $0xa0] sm:$0xff] }
  0x6b   :  { %1046 = vperm.xlu0 %3347, %v900_v24  }
  0x71   :  { %3080 = vmatmul.mubr.msk.bf16.gmra.mrb[40].mxu0 %vm267_vm0, %v3370_v25 }
  0x72   :  { %3083 = vmatprep.mubr.msk.bf16.mxu0 %vm267_vm0, %v3371_v26 }
  0x79   :  { %3084 = vmatmul.mubr.msk.bf16.gmra.mrb[44].mxu0 %vm267_vm0, %v3372_v27 }
  0x7a   :  { %3087 = vmatprep.mubr.msk.bf16.mxu0 %vm267_vm0, %v3373_v28 }
  0x81   :  { %3088 = vmatmul.mubr.msk.bf16.gmra.mrb[48].mxu0 %vm267_vm0, %v3374_v30 }
  0x82   :  { %3091 = vmatprep.mubr.msk.bf16.mxu0 %vm267_vm0, %v3375_v31 }
  0x89   :  { %3092 = vmatmul.mubr.msk.bf16.gmra.mrb[52].mxu0 %vm267_vm0, %v3376_v32  ;;  %v883_v32 = vld [vmem:[%s4419_s3 + $0x18] sm:$0xff] }
  0x8a   :  { %3095 = vmatprep.mubr.msk.bf16.mxu0 %vm267_vm0, %v3377_v33  ;;  %961 = vperm.xlu1 %3348, %v883_v32   ;;  %v909_v32 = vld [vmem:[%s4419_s3 + $0xe8] sm:$0xff] }
  0x91   :  { %3096 = vmatmul.mubr.msk.bf16.gmra.mrb[56].mxu0 %vm267_vm0, %v3378_v34 }
  0x92   :  { %3099 = vmatprep.mubr.msk.bf16.mxu0 %vm267_vm0, %v3379_v35  ;;  %v884_v35 = vld [vmem:[%s4419_s3 + $0x20] sm:$0xff] }
  0x93   :  { %966 = vperm.xlu0 %3347, %v884_v35  }
  0x99   :  { %3100 = vmatmul.mubr.msk.bf16.gmra.mrb[60].mxu0 %vm267_vm0, %v3380_v36  ;;  %v901_v36 = vld [vmem:[%s4419_s3 + $0xa8] sm:$0xff] }
  0x9a   :  { %2225 = vmatprep.mubr.bf16.mxu0 %v3409_v47  ;;  %1051 = vperm.xlu1 %3348, %v901_v36  }
  0xf4   :  { %v3041_v38 = vpop.f32.mrb[0].mxu0 }
  0xf5   :  { %v401_v39 = vpop.f32.mrb[1].mxu0  ;;  %v658_v41 = vmax.f32 %v3041_v38, 0.0 }
  0xf6   :  { %v3042_v40 = vpop.f32.mrb[2].mxu0  ;;  %v656_v44 = vmax.f32 %v401_v39, 0.0  ;;  %v902_v39 = vld [vmem:[%s4419_s3 + $0xb0] sm:$0xff] }
  0xf7   :  { %v659_v42 = vmax.f32 %v3042_v40, 0.0  ;;  %v404_v43 = vpop.f32.mrb[3].mxu0  ;;  %1056 = vperm.xlu0 %3347, %v902_v39   ;;  %v3386_v39 = vld [vmem:[#allocation3 + $0x20] ss:$16 sps:$4 sm:$0xff]  }
  0xf8   :  { %v657_v45 = vmax.f32 %v404_v43, 0.0 }
  0xf9   :  { %v849_v46 = vpack.c.bf16 %v659_v42, %v658_v41 }
  0xfa   :  { %v848_v48 = vpack.c.bf16 %v657_v45, %v656_v44 }
  0xfc   :  { %v3045_v49 = vpop.f32.mrb[4].mxu0  ;;  %1905 = vmatpush1.bf16.msra.mxu1 %v848_v48 }
  0xfd   :  { %v417_v50 = vpop.f32.mrb[5].mxu0  ;;  %1906 = vmatprep.subr.bf16.mxu1 %v3628_v29  ;;  %v662_v52 = vmax.f32 %v3045_v49, 0.0  ;;  %v886_v49 = vld [vmem:[%s4419_s3 + $0x30] sm:$0xff] }
  0xfe   :  { %v3046_v51 = vpop.f32.mrb[6].mxu0  ;;  %v660_v55 = vmax.f32 %v417_v50, 0.0  ;;  %v903_v50 = vld [vmem:[%s4419_s3 + $0xb8] sm:$0xff]  ;;  %976 = vperm.xlu0 %3347, %v886_v49  }
  0xff   :  { %v663_v53 = vmax.f32 %v3046_v51, 0.0  ;;  %v420_v54 = vpop.f32.mrb[7].mxu0 }
 0x100   :  { %v661_v56 = vmax.f32 %v420_v54, 0.0  ;;  %1907 = vmatpush1.bf16.msra.mxu1 %v849_v46  ;;  %v885_v46 = vld [vmem:[%s4419_s3 + $0x28] sm:$0xff] }
 0x101   :  { %v851_v57 = vpack.c.bf16 %v663_v53, %v662_v52  ;;  %1908 = vmatprep.subr.bf16.mxu1 %v3628_v29  ;;  %971 = vperm.xlu1 %3348, %v885_v46   ;;  %v904_v53 = vld [vmem:[%s4419_s3 + $0xc0] sm:$0xff]  ;;  %v894_v46 = vld [vmem:[%s4419_s3 + $0x70] sm:$0xff] }
 0x102   :  { %v850_v58 = vpack.c.bf16 %v661_v56, %v660_v55  ;;  %1066 = vperm.xlu0 %3347, %v904_v53  }
 0x104   :  { %v3049_v59 = vpop.f32.mrb[8].mxu0  ;;  %1909 = vmatpush1.bf16.msra.mxu1 %v850_v58 }
 0x105   :  { %v433_v61 = vpop.f32.mrb[9].mxu0  ;;  %1910 = vmatprep.subr.bf16.mxu1 %v3628_v29  ;;  %v666_v63 = vmax.f32 %v3049_v59, 0.0  ;;  %1061 = vperm.xlu1 %3348, %v903_v50  }
 0x106   :  { %v3050_v62 = vpop.f32.mrb[10].mxu0  ;;  %v664_v2 = vmax.f32 %v433_v61, 0.0 }
 0x107   :  { %v667_v0 = vmax.f32 %v3050_v62, 0.0  ;;  %v436_v1 = vpop.f32.mrb[11].mxu0 }
 0x108   :  { %v665_v3 = vmax.f32 %v436_v1, 0.0  ;;  %1911 = vmatpush1.bf16.msra.mxu1 %v851_v57 }
 0x109   :  { %v853_v4 = vpack.c.bf16 %v667_v0, %v666_v63  ;;  %1912 = vmatprep.subr.bf16.mxu1 %v3628_v29  ;;  %981 = vperm.xlu1 %3348, %v887_v60   ;;  %v888_v63 = vld [vmem:[%s4419_s3 + $0x40] sm:$0xff]  ;;  %v905_v0 = vld [vmem:[%s4419_s3 + $0xc8] sm:$0xff] }
 0x10a   :  { %v852_v5 = vpack.c.bf16 %v665_v3, %v664_v2  ;;  %986 = vperm.xlu0 %3347, %v888_v63   ;;  %v906_v3 = vld [vmem:[%s4419_s3 + $0xd0] sm:$0xff] }
 0x10c   :  { %v3053_v8 = vpop.f32.mrb[12].mxu0  ;;  %1913 = vmatpush1.bf16.msra.mxu1 %v852_v5 }
 0x10d   :  { %v449_v9 = vpop.f32.mrb[13].mxu0  ;;  %1914 = vmatprep.subr.bf16.mxu1 %v3628_v29  ;;  %v670_v12 = vmax.f32 %v3053_v8, 0.0  ;;  %1071 = vperm.xlu1 %3348, %v905_v0   ;;  %v929_v0 = vld [vmem:[%s4419_s3 + $0x188] sm:$0xff] }
 0x10e   :  { %v3054_v11 = vpop.f32.mrb[14].mxu0  ;;  %v668_v15 = vmax.f32 %v449_v9, 0.0  ;;  %1076 = vperm.xlu0 %3347, %v906_v3  }
 0x10f   :  { %v671_v13 = vmax.f32 %v3054_v11, 0.0  ;;  %v452_v14 = vpop.f32.mrb[15].mxu0 }
 0x110   :  { %v669_v16 = vmax.f32 %v452_v14, 0.0  ;;  %1915 = vmatpush1.bf16.msra.mxu1 %v853_v4  ;;  %v907_v14 = vld [vmem:[%s4419_s3 + $0xd8] sm:$0xff] }
 0x111   :  { %v855_v18 = vpack.c.bf16 %v671_v13, %v670_v12  ;;  %1916 = vmatprep.subr.bf16.mxu1 %v3628_v29  ;;  %991 = vperm.xlu1 %3348, %v889_v10   ;;  %v890_v13 = vld [vmem:[%s4419_s3 + $0x50] sm:$0xff] }
 0x112   :  { %v854_v19 = vpack.c.bf16 %v669_v16, %v668_v15  ;;  %996 = vperm.xlu0 %3347, %v890_v13   ;;  %v913_v13 = vld [vmem:[%s4419_s3 + $0x108] sm:$0xff] }
 0x114   :  { %v3057_v22 = vpop.f32.mrb[16].mxu0  ;;  %1917 = vmatpush1.bf16.msra.mxu1 %v854_v19 }
 0x115   :  { %v465_v23 = vpop.f32.mrb[17].mxu0  ;;  %1918 = vmatprep.subr.bf16.mxu1 %v3628_v29  ;;  %v674_v26 = vmax.f32 %v3057_v22, 0.0  ;;  %1081 = vperm.xlu1 %3348, %v907_v14  }
 0x116   :  { %v3058_v25 = vpop.f32.mrb[18].mxu0  ;;  %v672_v30 = vmax.f32 %v465_v23, 0.0  ;;  %v3381_v23 = vld [vmem:[#allocation3] ss:$16 sps:$4 sm:$0xff]  }
 0x117   :  { %v675_v27 = vmax.f32 %v3058_v25, 0.0  ;;  %v468_v28 = vpop.f32.mrb[19].mxu0  ;;  %v891_v25 = vld [vmem:[%s4419_s3 + $0x58] sm:$0xff] }
 0x118   :  { %v673_v31 = vmax.f32 %v468_v28, 0.0  ;;  %1919 = vmatpush1.bf16.msra.mxu1 %v855_v18  ;;  %v908_v18 = vld [vmem:[%s4419_s3 + $0xe0] sm:$0xff] }
 0x119   :  { %v857_v33 = vpack.c.bf16 %v675_v27, %v674_v26  ;;  %1920 = vmatprep.subr.bf16.mxu1 %v3628_v29  ;;  %1086 = vperm.xlu0 %3347, %v908_v18   ;;  %v3384_v28 = vld [vmem:[#allocation3 + $0x24] ss:$16 sps:$4 sm:$0xff]  }
 0x11a   :  { %v856_v34 = vpack.c.bf16 %v673_v31, %v672_v30  ;;  %1001 = vperm.xlu1 %3348, %v891_v25   ;;  %v892_v30 = vld [vmem:[%s4419_s3 + $0x60] sm:$0xff] }
 0x11b   :  { %v916_v25 = vld [vmem:[%s4419_s3 + $0x120] sm:$0xff] }
 0x11c   :  { %v3061_v37 = vpop.f32.mrb[20].mxu0  ;;  %1921 = vmatpush1.bf16.msra.mxu1 %v856_v34 }
 0x11d   :  { %v481_v38 = vpop.f32.mrb[21].mxu0  ;;  %1922 = vmatprep.subr.bf16.mxu1 %v3628_v29  ;;  %v678_v41 = vmax.f32 %v3061_v37, 0.0  ;;  %1006 = vperm.xlu0 %3347, %v892_v30   ;;  %v931_v30 = vld [vmem:[%s4419_s3 + $0x198] sm:$0xff] }
 0x11e   :  { %v3062_v40 = vpop.f32.mrb[22].mxu0  ;;  %v676_v44 = vmax.f32 %v481_v38, 0.0  ;;  %1091 = vperm.xlu1 %3348, %v909_v32   ;;  %v932_v32 = vld [vmem:[%s4419_s3 + $0x1a0] sm:$0xff] }
 0x11f   :  { %v679_v42 = vmax.f32 %v3062_v40, 0.0  ;;  %v484_v43 = vpop.f32.mrb[23].mxu0  ;;  %v910_v40 = vld [vmem:[%s4419_s3 + $0xf0] sm:$0xff] }
 0x120   :  { %v677_v45 = vmax.f32 %v484_v43, 0.0  ;;  %1923 = vmatpush1.bf16.msra.mxu1 %v857_v33 }
 0x121   :  { %v859_v47 = vpack.c.bf16 %v679_v42, %v678_v41  ;;  %1924 = vmatprep.subr.bf16.mxu1 %v3628_v29  ;;  %v893_v42 = vld [vmem:[%s4419_s3 + $0x68] sm:$0xff]  ;;  %1096 = vperm.xlu0 %3347, %v910_v40  }
 0x122   :  { %v858_v48 = vpack.c.bf16 %v677_v45, %v676_v44  ;;  %v3387_v45 = vld [vmem:[#allocation3 + $0x44] ss:$16 sps:$4 sm:$0xff]   ;;  %1011 = vperm.xlu1 %3348, %v893_v42  }
 0x123   :  { %v917_v40 = vld [vmem:[%s4419_s3 + $0x128] sm:$0xff]  ;;  %v918_v42 = vld [vmem:[%s4419_s3 + $0x130] sm:$0xff] }
 0x124   :  { %v3065_v51 = vpop.f32.mrb[24].mxu0  ;;  %1925 = vmatpush1.bf16.msra.mxu1 %v858_v48  ;;  %v911_v48 = vld [vmem:[%s4419_s3 + $0xf8] sm:$0xff] }
 0x125   :  { %v497_v52 = vpop.f32.mrb[25].mxu0  ;;  %1926 = vmatprep.subr.bf16.mxu1 %v3628_v29  ;;  %v682_v55 = vmax.f32 %v3065_v51, 0.0  ;;  %1016 = vperm.xlu0 %3347, %v894_v46   ;;  %v933_v46 = vld [vmem:[%s4419_s3 + $0x1a8] sm:$0xff] }
 0x126   :  { %v3066_v54 = vpop.f32.mrb[26].mxu0  ;;  %v680_v58 = vmax.f32 %v497_v52, 0.0  ;;  %1101 = vperm.xlu1 %3348, %v911_v48   ;;  %v934_v48 = vld [vmem:[%s4419_s3 + $0x1b0] sm:$0xff] }
 0x127   :  { %v683_v56 = vmax.f32 %v3066_v54, 0.0  ;;  %v500_v57 = vpop.f32.mrb[27].mxu0 }
 0x128   :  { %v681_v59 = vmax.f32 %v500_v57, 0.0  ;;  %1927 = vmatpush1.bf16.msra.mxu1 %v859_v47 }
 0x129   :  { %v861_v61 = vpack.c.bf16 %v683_v56, %v682_v55  ;;  %1928 = vmatprep.subr.bf16.mxu1 %v3628_v29  ;;  %v3389_v55 = vld [vmem:[#allocation3 + $0x40] ss:$16 sps:$4 sm:$0xff]  }
 0x12a   :  { %v860_v62 = vpack.c.bf16 %v681_v59, %v680_v58  ;;  %v928_v56 = vld [vmem:[%s4419_s3 + $0x180] sm:$0xff]  ;;  %v895_v58 = vld [vmem:[%s4419_s3 + $0x78] sm:$0xff] }
 0x12b   :  { %1186 = vperm.xlu0 %3347, %v928_v56   ;;  %1021 = vperm.xlu1 %3348, %v895_v58   ;;  %v919_v56 = vld [vmem:[%s4419_s3 + $0x138] sm:$0xff]  ;;  %v920_v58 = vld [vmem:[%s4419_s3 + $0x140] sm:$0xff] }
 0x12c   :  { %v3069_v1 = vpop.f32.mrb[28].mxu0  ;;  %1929 = vmatpush1.bf16.msra.mxu1 %v860_v62  ;;  %v912_v62 = vld [vmem:[%s4419_s3 + $0x100] sm:$0xff] }
 0x12d   :  { %v513_v2 = vpop.f32.mrb[29].mxu0  ;;  %1930 = vmatprep.subr.bf16.mxu1 %v3628_v29  ;;  %v686_v5 = vmax.f32 %v3069_v1, 0.0 }
 0x12e   :  { %v3070_v4 = vpop.f32.mrb[30].mxu0  ;;  %v684_v8 = vmax.f32 %v513_v2, 0.0 }
 0x12f   :  { %v687_v6 = vmax.f32 %v3070_v4, 0.0  ;;  %v516_v7 = vpop.f32.mrb[31].mxu0  ;;  %1106 = vperm.xlu0 %3347, %v912_v62   ;;  %1191 = vperm.xlu1 %3348, %v929_v0   ;;  %v935_v62 = vld [vmem:[%s4419_s3 + $0x1b8] sm:$0xff]  ;;  %v936_v0 = vld [vmem:[%s4419_s3 + $0x1c0] sm:$0xff] }
 0x130   :  { %v685_v9 = vmax.f32 %v516_v7, 0.0  ;;  %1931 = vmatpush1.bf16.msra.mxu1 %v861_v61  ;;  %v3390_v61 = vld [vmem:[#allocation3 + $0x64] ss:$16 sps:$4 sm:$0xff]   ;;  %v3392_v7 = vld [vmem:[#allocation3 + $0x60] ss:$16 sps:$4 sm:$0xff]  }
 0x131   :  { %v863_v11 = vpack.c.bf16 %v687_v6, %v686_v5  ;;  %1932 = vmatprep.subr.bf16.mxu1 %v3628_v29 }
 0x132   :  { %v862_v12 = vpack.c.bf16 %v685_v9, %v684_v8  ;;  %v914_v8 = vld [vmem:[%s4419_s3 + $0x110] sm:$0xff] }
 0x133   :  { %1116 = vperm.xlu0 %3347, %v914_v8   ;;  %1111 = vperm.xlu1 %3348, %v913_v13   ;;  %v921_v8 = vld [vmem:[%s4419_s3 + $0x148] sm:$0xff] }
 0x134   :  { %v3073_v15 = vpop.f32.mrb[32].mxu0  ;;  %1933 = vmatpush1.bf16.msra.mxu1 %v862_v12  ;;  %v3393_v12 = vld [vmem:[#allocation3 + $0x84] ss:$16 sps:$4 sm:$0xff]  }
 0x135   :  { %v690_v16 = vmax.f32 %v3073_v15, 0.0  ;;  %v529_v17 = vpop.f32.mrb[33].mxu0  ;;  %1934 = vmatprep.subr.bf16.mxu1 %v3628_v29  ;;  %v930_v15 = vld [vmem:[%s4419_s3 + $0x190] sm:$0xff] }
 0x136   :  { %v688_v19 = vmax.f32 %v529_v17, 0.0  ;;  %v3074_v20 = vpop.f32.mrb[34].mxu0  ;;  %v3405_v13 = vld [vmem:[#allocation3 + $0x104] ss:$16 sps:$4 sm:$0xff]  }
 0x137   :  { %v691_v21 = vmax.f32 %v3074_v20, 0.0  ;;  %v532_v22 = vpop.f32.mrb[35].mxu0  ;;  %1196 = vperm.xlu0 %3347, %v930_v15   ;;  %v938_v15 = vld [vmem:[%s4419_s3 + $0x1d0] sm:$0xff] }
 0x138   :  { %v689_v24 = vmax.f32 %v532_v22, 0.0  ;;  %1935 = vmatpush1.bf16.msra.mxu1 %v863_v11  ;;  %v3395_v22 = vld [vmem:[#allocation3 + $0x80] ss:$16 sps:$4 sm:$0xff]  }
 0x139   :  { %v865_v26 = vpack.c.bf16 %v691_v21, %v690_v16  ;;  %3167 = vmatprep.subr.bf16.mxu1 %v3628_v29 }
 0x13a   :  { %v864_v27 = vpack.c.bf16 %v689_v24, %v688_v19 }
 0x13b   :  { %1937 = vmatmul.mubr.bf16.vlgmr.msra.gmra.mrb[0].mxu1 %v3381_v23  ;;  %v915_v23 = vld [vmem:[%s4419_s3 + $0x118] sm:$0xff]  ;;  %1126 = vperm.xlu0 %3347, %v916_v25   ;;  %v925_v25 = vld [vmem:[%s4419_s3 + $0x168] sm:$0xff] }
 0x13c   :  { %v3077_v31 = vpop.f32.mrb[36].mxu0  ;;  %2194 = vmatpush1.bf16.msra.mxu0 %v864_v27  ;;  %3183 = vmatpush1.bf16.msra.mxu1 %v864_v27 }
 0x13d   :  { %v694_v33 = vmax.f32 %v3077_v31, 0.0  ;;  %v545_v34 = vpop.f32.mrb[37].mxu0  ;;  %2195 = vmatprep.subr.bf16.mxu0 %v3628_v29  ;;  %3168 = vmatprep.subr.bf16.mxu1 %v3628_v29 }
 0x13e   :  { %v692_v35 = vmax.f32 %v545_v34, 0.0  ;;  %v3078_v36 = vpop.f32.mrb[38].mxu0  ;;  %1944 = vmatprep.mubr.bf16.mxu1 %v3384_v28  ;;  %v3396_v28 = vld [vmem:[#allocation3 + $0xa4] ss:$16 sps:$4 sm:$0xff]   ;;  %1121 = vperm.xlu1 %3348, %v915_v23   ;;  %v3415_v23 = vld [vmem:[#allocation3 + $0x120] ss:$16 sps:$4 sm:$0xff]  }
 0x13f   :  { %v695_v37 = vmax.f32 %v3078_v36, 0.0  ;;  %v548_v38 = vpop.f32.mrb[39].mxu0  ;;  %1206 = vperm.xlu0 %3347, %v932_v32   ;;  %v3421_v32 = vld [vmem:[#allocation3 + $0x140] ss:$16 sps:$4 sm:$0xff]  }
 0x140   :  { %v693_v41 = vmax.f32 %v548_v38, 0.0  ;;  %2196 = vmatpush1.bf16.msra.mxu0 %v865_v26  ;;  %3184 = vmatpush1.bf16.msra.mxu1 %v865_v26 }
 0x141   :  { %v867_v43 = vpack.c.bf16 %v695_v37, %v694_v33  ;;  %2197 = vmatprep.subr.bf16.mxu0 %v3628_v29  ;;  %3169 = vmatprep.subr.bf16.mxu1 %v3628_v29 }
 0x142   :  { %v866_v44 = vpack.c.bf16 %v693_v41, %v692_v35  ;;  %1201 = vperm.xlu1 %3348, %v931_v30   ;;  %v941_v30 = vld [vmem:[%s4419_s3 + $0x1e8] sm:$0xff] }
 0x143   :  { %1945 = vmatmul.mubr.bf16.gmra.mrb[4].mxu1 %v3386_v39  ;;  %v3398_v39 = vld [vmem:[#allocation3 + $0xa0] ss:$16 sps:$4 sm:$0xff]   ;;  %1136 = vperm.xlu0 %3347, %v918_v42   ;;  %v3431_v42 = vld [vmem:[#allocation3 + $0x8c] ss:$16 sps:$4 sm:$0xff]  }
 0x144   :  { %v3081_v47 = vpop.f32.mrb[40].mxu0  ;;  %2198 = vmatpush1.bf16.msra.mxu0 %v866_v44  ;;  %3185 = vmatpush1.bf16.msra.mxu1 %v866_v44 }
 0x145   :  { %v698_v49 = vmax.f32 %v3081_v47, 0.0  ;;  %v561_v50 = vpop.f32.mrb[41].mxu0  ;;  %2199 = vmatprep.subr.bf16.mxu0 %v3628_v29  ;;  %3170 = vmatprep.subr.bf16.mxu1 %v3628_v29 }
 0x146   :  { %v696_v51 = vmax.f32 %v561_v50, 0.0  ;;  %v3082_v52 = vpop.f32.mrb[42].mxu0  ;;  %1952 = vmatprep.mubr.bf16.mxu1 %v3387_v45  ;;  %v3399_v45 = vld [vmem:[#allocation3 + $0xc4] ss:$16 sps:$4 sm:$0xff]   ;;  %1131 = vperm.xlu1 %3348, %v917_v40   ;;  %v3428_v40 = vld [vmem:[#allocation3 + $0x68] ss:$16 sps:$4 sm:$0xff]  }
 0x147   :  { %v699_v53 = vmax.f32 %v3082_v52, 0.0  ;;  %v564_v54 = vpop.f32.mrb[43].mxu0  ;;  %1216 = vperm.xlu0 %3347, %v934_v48   ;;  %v3440_v48 = vld [vmem:[#allocation3 + $0xa8] ss:$16 sps:$4 sm:$0xff]  }
 0x148   :  { %v697_v57 = vmax.f32 %v564_v54, 0.0  ;;  %2200 = vmatpush1.bf16.msra.mxu0 %v867_v43  ;;  %3186 = vmatpush1.bf16.msra.mxu1 %v867_v43 }
 0x149   :  { %v869_v59 = vpack.c.bf16 %v699_v53, %v698_v49  ;;  %2201 = vmatprep.subr.bf16.mxu0 %v3628_v29  ;;  %3171 = vmatprep.subr.bf16.mxu1 %v3628_v29 }
 0x14a   :  { %v868_v60 = vpack.c.bf16 %v697_v57, %v696_v51  ;;  %1211 = vperm.xlu1 %3348, %v933_v46   ;;  %v3437_v46 = vld [vmem:[#allocation3 + $0xac] ss:$16 sps:$4 sm:$0xff]  }
 0x14b   :  { %1953 = vmatmul.mubr.bf16.gmra.mrb[8].mxu1 %v3389_v55  ;;  %v3401_v55 = vld [vmem:[#allocation3 + $0xc0] ss:$16 sps:$4 sm:$0xff]   ;;  %1146 = vperm.xlu0 %3347, %v920_v58   ;;  %v3455_v58 = vld [vmem:[#allocation3 + $0x10c] ss:$16 sps:$4 sm:$0xff]  }
 0x14c   :  { %v3085_v63 = vpop.f32.mrb[44].mxu0  ;;  %2202 = vmatpush1.bf16.msra.mxu0 %v868_v60  ;;  %3187 = vmatpush1.bf16.msra.mxu1 %v868_v60 }
 0x14d   :  { %v702_v1 = vmax.f32 %v3085_v63, 0.0  ;;  %v577_v2 = vpop.f32.mrb[45].mxu0  ;;  %2203 = vmatprep.subr.bf16.mxu0 %v3628_v29  ;;  %3172 = vmatprep.subr.bf16.mxu1 %v3628_v29 }
 0x14e   :  { %v700_v3 = vmax.f32 %v577_v2, 0.0  ;;  %v3086_v4 = vpop.f32.mrb[46].mxu0  ;;  %1960 = vmatprep.mubr.bf16.mxu1 %v3390_v61  ;;  %v3402_v61 = vld [vmem:[#allocation3 + $0xe4] ss:$16 sps:$4 sm:$0xff]   ;;  %1141 = vperm.xlu1 %3348, %v919_v56   ;;  %v3452_v56 = vld [vmem:[#allocation3 + $0xe8] ss:$16 sps:$4 sm:$0xff]  }
 0x14f   :  { %v703_v5 = vmax.f32 %v3086_v4, 0.0  ;;  %v580_v6 = vpop.f32.mrb[47].mxu0  ;;  %1226 = vperm.xlu0 %3347, %v936_v0   ;;  %v3464_v0 = vld [vmem:[#allocation3 + $0x128] ss:$16 sps:$4 sm:$0xff]  }
 0x150   :  { %v701_v9 = vmax.f32 %v580_v6, 0.0  ;;  %2204 = vmatpush1.bf16.msra.mxu0 %v869_v59  ;;  %3188 = vmatpush1.bf16.msra.mxu1 %v869_v59 }
 0x151   :  { %v871_v10 = vpack.c.bf16 %v703_v5, %v702_v1  ;;  %2205 = vmatprep.subr.bf16.mxu0 %v3628_v29  ;;  %3173 = vmatprep.subr.bf16.mxu1 %v3628_v29 }
 0x152   :  { %v870_v11 = vpack.c.bf16 %v701_v9, %v700_v3  ;;  %1221 = vperm.xlu1 %3348, %v935_v62   ;;  %v3461_v62 = vld [vmem:[#allocation3 + $0x12c] ss:$16 sps:$4 sm:$0xff]  }
 0x153   :  { %1961 = vmatmul.mubr.bf16.gmra.mrb[12].mxu1 %v3392_v7  ;;  %v3404_v7 = vld [vmem:[#allocation3 + $0xe0] ss:$16 sps:$4 sm:$0xff]  }
 0x154   :  { %v3089_v14 = vpop.f32.mrb[48].mxu0  ;;  %2206 = vmatpush1.bf16.msra.mxu0 %v870_v11  ;;  %3189 = vmatpush1.bf16.msra.mxu1 %v870_v11 }
 0x155   :  { %v706_v16 = vmax.f32 %v3089_v14, 0.0  ;;  %v593_v17 = vpop.f32.mrb[49].mxu0  ;;  %2207 = vmatprep.subr.bf16.mxu0 %v3628_v29  ;;  %3174 = vmatprep.subr.bf16.mxu1 %v3628_v29  ;;  %v937_v14 = vld [vmem:[%s4419_s3 + $0x1c8] sm:$0xff] }
 0x156   :  { %v704_v18 = vmax.f32 %v593_v17, 0.0  ;;  %v3090_v19 = vpop.f32.mrb[50].mxu0  ;;  %1968 = vmatprep.mubr.bf16.mxu1 %v3393_v12  ;;  %1151 = vperm.xlu1 %3348, %v921_v8   ;;  %v3410_v17 = vld [vmem:[#allocation3 + $0x100] ss:$16 sps:$4 sm:$0xff]   ;;  %v3476_v8 = vld [vmem:[#allocation3 + $0x168] ss:$16 sps:$4 sm:$0xff]  }
 0x157   :  { %v707_v20 = vmax.f32 %v3090_v19, 0.0  ;;  %v596_v21 = vpop.f32.mrb[51].mxu0  ;;  %v3411_v19 = vld [vmem:[#allocation3 + $0x124] ss:$16 sps:$4 sm:$0xff]  }
 0x158   :  { %v705_v24 = vmax.f32 %v596_v21, 0.0  ;;  %2208 = vmatpush1.bf16.msra.mxu0 %v871_v10  ;;  %3190 = vmatpush1.bf16.msra.mxu1 %v871_v10  ;;  %v922_v10 = vld [vmem:[%s4419_s3 + $0x150] sm:$0xff]  ;;  %v924_v21 = vld [vmem:[%s4419_s3 + $0x160] sm:$0xff] }
 0x159   :  { %v873_v26 = vpack.c.bf16 %v707_v20, %v706_v16  ;;  %2209 = vmatprep.subr.bf16.mxu0 %v3628_v29  ;;  %3175 = vmatprep.subr.bf16.mxu1 %v3628_v29  ;;  %v3407_v16 = vld [vmem:[#allocation3 + $0x8] ss:$16 sps:$4 sm:$0xff]   ;;  %v3413_v20 = vld [vmem:[#allocation3 + $0x2c] ss:$16 sps:$4 sm:$0xff]  }
 0x15a   :  { %v872_v27 = vpack.c.bf16 %v705_v24, %v704_v18  ;;  %1156 = vperm.xlu0 %3347, %v922_v10   ;;  %1231 = vperm.xlu1 %3348, %v937_v14   ;;  %v923_v18 = vld [vmem:[%s4419_s3 + $0x158] sm:$0xff] }
 0x15b   :  { %1969 = vmatmul.mubr.bf16.gmra.mrb[16].mxu1 %v3395_v22  ;;  %v940_v22 = vld [vmem:[%s4419_s3 + $0x1e0] sm:$0xff]  ;;  %v3416_v24 = vld [vmem:[#allocation3 + $0x28] ss:$16 sps:$4 sm:$0xff]  }
 0x15c   :  { %v3093_v31 = vpop.f32.mrb[52].mxu0  ;;  %2210 = vmatpush1.bf16.msra.mxu0 %v872_v27  ;;  %3191 = vmatpush1.bf16.msra.mxu1 %v872_v27  ;;  %v3419_v27 = vld [vmem:[#allocation3 + $0x4c] ss:$16 sps:$4 sm:$0xff]  }
 0x15d   :  { %v710_v33 = vmax.f32 %v3093_v31, 0.0  ;;  %v609_v34 = vpop.f32.mrb[53].mxu0  ;;  %2211 = vmatprep.subr.bf16.mxu0 %v3628_v29  ;;  %3176 = vmatprep.subr.bf16.mxu1 %v3628_v29  ;;  %v942_v31 = vld [vmem:[%s4419_s3 + $0x1f0] sm:$0xff] }
 0x15e   :  { %v708_v35 = vmax.f32 %v609_v34, 0.0  ;;  %v3094_v36 = vpop.f32.mrb[54].mxu0  ;;  %1976 = vmatprep.mubr.bf16.mxu1 %v3396_v28  ;;  %1236 = vperm.xlu0 %3347, %v938_v15   ;;  %v926_v28 = vld [vmem:[%s4419_s3 + $0x170] sm:$0xff]  ;;  %v927_v34 = vld [vmem:[%s4419_s3 + $0x178] sm:$0xff] }
 0x15f   :  { %v711_v37 = vmax.f32 %v3094_v36, 0.0  ;;  %v612_v38 = vpop.f32.mrb[55].mxu0  ;;  %1161 = vperm.xlu1 %3348, %v923_v18   ;;  %v3425_v36 = vld [vmem:[#allocation3 + $0x6c] ss:$16 sps:$4 sm:$0xff]   ;;  %v3487_v15 = vld [vmem:[#allocation3 + $0x2a0] ss:$16 sps:$4 sm:$0xff]  }
 0x160   :  { %v709_v41 = vmax.f32 %v612_v38, 0.0  ;;  %2212 = vmatpush1.bf16.msra.mxu0 %v873_v26  ;;  %3192 = vmatpush1.bf16.msra.mxu1 %v873_v26  ;;  %v3417_v26 = vld [vmem:[#allocation3 + $0x144] ss:$16 sps:$4 sm:$0xff]   ;;  %v3479_v10 = vld [vmem:[#allocation3 + $0x18c] ss:$16 sps:$4 sm:$0xff]  }
 0x161   :  { %v875_v43 = vpack.c.bf16 %v711_v37, %v710_v33  ;;  %2213 = vmatprep.subr.bf16.mxu0 %v3628_v29  ;;  %3177 = vmatprep.subr.bf16.mxu1 %v3628_v29  ;;  %v3422_v33 = vld [vmem:[#allocation3 + $0x48] ss:$16 sps:$4 sm:$0xff]   ;;  %v2547_v37 = vld [vmem:[#allocation2] sm:$0x1] }
 0x162   :  { %v874_v44 = vpack.c.bf16 %v709_v41, %v708_v35  ;;  %1166 = vperm.xlu0 %3347, %v924_v21   ;;  %v3423_v35 = vld [vmem:[#allocation3 + $0x164] ss:$16 sps:$4 sm:$0xff]   ;;  %v3485_v14 = vld [vmem:[#allocation3 + $0x1ac] ss:$16 sps:$4 sm:$0xff]  }
 0x163   :  { %1977 = vmatmul.mubr.bf16.gmra.mrb[20].mxu1 %v3398_v39  ;;  %v943_v38 = vld [vmem:[%s4419_s3 + $0x1f8] sm:$0xff]  ;;  %v3427_v39 = vld [vmem:[#allocation3 + $0x160] ss:$16 sps:$4 sm:$0xff]  }
 0x164   :  { %v3097_v47 = vpop.f32.mrb[56].mxu0  ;;  %2214 = vmatpush1.bf16.msra.mxu0 %v874_v44  ;;  %3193 = vmatpush1.bf16.msra.mxu1 %v874_v44  ;;  %v3429_v41 = vld [vmem:[#allocation3 + $0x184] ss:$16 sps:$4 sm:$0xff]   ;;  %v3434_v44 = vld [vmem:[#allocation3 + $0x88] ss:$16 sps:$4 sm:$0xff]  }
 0x165   :  { %v714_v49 = vmax.f32 %v3097_v47, 0.0  ;;  %v625_v50 = vpop.f32.mrb[57].mxu0  ;;  %2215 = vmatprep.subr.bf16.mxu0 %v3628_v29  ;;  %3178 = vmatprep.subr.bf16.mxu1 %v3628_v29  ;;  %v3439_v47 = vld [vmem:[#allocation3 + $0x1a0] ss:$16 sps:$4 sm:$0xff]   ;;  %v3491_v18 = vld [vmem:[#allocation3 + $0x1cc] ss:$16 sps:$4 sm:$0xff]  }
 0x166   :  { %v712_v51 = vmax.f32 %v625_v50, 0.0  ;;  %v3098_v52 = vpop.f32.mrb[58].mxu0  ;;  %1984 = vmatprep.mubr.bf16.mxu1 %v3399_v45  ;;  %1246 = vperm.xlu0 %3347, %v940_v22   ;;  %v3435_v45 = vld [vmem:[#allocation3 + $0x1a4] ss:$16 sps:$4 sm:$0xff]   ;;  %v3443_v50 = vld [vmem:[#allocation3 + $0xcc] ss:$16 sps:$4 sm:$0xff]  }
 0x167   :  { %v715_v53 = vmax.f32 %v3098_v52, 0.0  ;;  %v628_v54 = vpop.f32.mrb[59].mxu0  ;;  %v3446_v52 = vld [vmem:[#allocation3 + $0xc8] ss:$16 sps:$4 sm:$0xff]   ;;  %v3495_v21 = vld [vmem:[#allocation3 + $0x2e4] ss:$16 sps:$4 sm:$0xff]  }
 0x168   :  { %v713_v57 = vmax.f32 %v628_v54, 0.0  ;;  %2216 = vmatpush1.bf16.msra.mxu0 %v875_v43  ;;  %3194 = vmatpush1.bf16.msra.mxu1 %v875_v43  ;;  %v3433_v43 = vld [vmem:[#allocation3 + $0x180] ss:$16 sps:$4 sm:$0xff]   ;;  %v3449_v54 = vld [vmem:[#allocation3 + $0xec] ss:$16 sps:$4 sm:$0xff]  }
 0x169   :  { %v877_v59 = vpack.c.bf16 %v715_v53, %v714_v49  ;;  %2217 = vmatprep.subr.bf16.mxu0 %v3628_v29  ;;  %3179 = vmatprep.subr.bf16.mxu1 %v3628_v29  ;;  %v3441_v49 = vld [vmem:[#allocation3 + $0x1c4] ss:$16 sps:$4 sm:$0xff]   ;;  %v3499_v22 = vld [vmem:[#allocation3 + $0x2e0] ss:$16 sps:$4 sm:$0xff]  }
 0x16a   :  { %v876_v60 = vpack.c.bf16 %v713_v57, %v712_v51  ;;  %1176 = vperm.xlu0 %3347, %v926_v28   ;;  %v3445_v51 = vld [vmem:[#allocation3 + $0x1c0] ss:$16 sps:$4 sm:$0xff]   ;;  %v3447_v53 = vld [vmem:[#allocation3 + $0x1e4] ss:$16 sps:$4 sm:$0xff]  }
 0x16b   :  { %1985 = vmatmul.mubr.bf16.gmra.mrb[24].mxu1 %v3401_v55  ;;  %v3451_v55 = vld [vmem:[#allocation3 + $0x1e0] ss:$16 sps:$4 sm:$0xff]   ;;  %v3453_v57 = vld [vmem:[#allocation3 + $0x204] ss:$16 sps:$4 sm:$0xff]  }
 0x16c   :  { %v3101_v63 = vpop.f32.mrb[60].mxu0  ;;  %2218 = vmatpush1.bf16.msra.mxu0 %v876_v60  ;;  %3195 = vmatpush1.bf16.msra.mxu1 %v876_v60  ;;  %v3458_v60 = vld [vmem:[#allocation3 + $0x108] ss:$16 sps:$4 sm:$0xff]   ;;  %v3507_v28 = vld [vmem:[#allocation3 + $0x324] ss:$16 sps:$4 sm:$0xff]  }
 0x16d   :  { %v718_v1 = vmax.f32 %v3101_v63, 0.0  ;;  %v641_v2 = vpop.f32.mrb[61].mxu0  ;;  %2219 = vmatprep.subr.bf16.mxu0 %v3628_v29  ;;  %3180 = vmatprep.subr.bf16.mxu1 %v3628_v29  ;;  %v3463_v63 = vld [vmem:[#allocation3 + $0x220] ss:$16 sps:$4 sm:$0xff]  }
 0x16e   :  { %v716_v3 = vmax.f32 %v641_v2, 0.0  ;;  %v3102_v4 = vpop.f32.mrb[62].mxu0  ;;  %1992 = vmatprep.mubr.bf16.mxu1 %v3402_v61  ;;  %1256 = vperm.xlu0 %3347, %v942_v31   ;;  %v3459_v61 = vld [vmem:[#allocation3 + $0x224] ss:$16 sps:$4 sm:$0xff]   ;;  %v3467_v2 = vld [vmem:[#allocation3 + $0x14c] ss:$16 sps:$4 sm:$0xff]  }
 0x16f   :  { %v719_v5 = vmax.f32 %v3102_v4, 0.0  ;;  %v644_v6 = vpop.f32.mrb[63].mxu0  ;;  %v3470_v4 = vld [vmem:[#allocation3 + $0x148] ss:$16 sps:$4 sm:$0xff]   ;;  %v3511_v31 = vld [vmem:[#allocation3 + $0x320] ss:$16 sps:$4 sm:$0xff]  }
 0x170   :  { %v717_v9 = vmax.f32 %v644_v6, 0.0  ;;  %2220 = vmatpush1.bf16.msra.mxu0 %v877_v59  ;;  %3196 = vmatpush1.bf16.msra.mxu1 %v877_v59  ;;  %v3457_v59 = vld [vmem:[#allocation3 + $0x200] ss:$16 sps:$4 sm:$0xff]   ;;  %v3473_v6 = vld [vmem:[#allocation3 + $0x16c] ss:$16 sps:$4 sm:$0xff]  }
 0x171   :  { %v879_v11 = vpack.c.bf16 %v719_v5, %v718_v1  ;;  %2221 = vmatprep.subr.bf16.mxu0 %v3628_v29  ;;  %3181 = vmatprep.subr.bf16.mxu1 %v3628_v29  ;;  %v3465_v1 = vld [vmem:[#allocation3 + $0x244] ss:$16 sps:$4 sm:$0xff]  }
 0x172   :  { %v878_v12 = vpack.c.bf16 %v717_v9, %v716_v3  ;;  %2550 = vperm.xlu0 %3347, %v2547_v37   ;;  %v3469_v3 = vld [vmem:[#allocation3 + $0x240] ss:$16 sps:$4 sm:$0xff]   ;;  %v3471_v5 = vld [vmem:[#allocation3 + $0x264] ss:$16 sps:$4 sm:$0xff]  }
 0x173   :  { %1993 = vmatmul.mubr.bf16.gmra.mrb[28].mxu1 %v3404_v7  ;;  %v3475_v7 = vld [vmem:[#allocation3 + $0x260] ss:$16 sps:$4 sm:$0xff]   ;;  %v3477_v9 = vld [vmem:[#allocation3 + $0x284] ss:$16 sps:$4 sm:$0xff]  }
 0x174   :  { %2222 = vmatpush1.bf16.msra.mxu0 %v878_v12  ;;  %3197 = vmatpush1.bf16.msra.mxu1 %v878_v12  ;;  %v3482_v12 = vld [vmem:[#allocation3 + $0x188] ss:$16 sps:$4 sm:$0xff]   ;;  %v3519_v37 = vld [vmem:[#allocation3 + $0x364] ss:$16 sps:$4 sm:$0xff]  }
 0x175   :  { %2223 = vmatprep.subr.bf16.mxu0 %v3628_v29  ;;  %3182 = vmatprep.subr.bf16.mxu1 %v3628_v29  ;;  %v939_v29 = vld [vmem:[%s4419_s3 + $0x1d8] sm:$0xff] }
 0x176   :  { %2000 = vmatprep.mubr.bf16.mxu1 %v3405_v13  ;;  %1241 = vperm.xlu1 %3348, %v939_v29   ;;  %v3483_v13 = vld [vmem:[#allocation3 + $0x2a4] ss:$16 sps:$4 sm:$0xff]   ;;  %v3497_v29 = vld [vmem:[#allocation3 + $0x1ec] ss:$16 sps:$4 sm:$0xff]  }
 0x178   :  { %2224 = vmatpush1.bf16.msra.mxu0 %v879_v11  ;;  %3198 = vmatpush1.bf16.msra.mxu1 %v879_v11  ;;  %v3481_v11 = vld [vmem:[#allocation3 + $0x280] ss:$16 sps:$4 sm:$0xff]  }
 0x17a   :  { %1171 = vperm.xlu1 %3348, %v925_v25   ;;  %v3503_v25 = vld [vmem:[#allocation3 + $0x20c] ss:$16 sps:$4 sm:$0xff]  }
 0x17b   :  { %2001 = vmatmul.mubr.bf16.gmra.mrb[32].mxu1 %v3410_v17  ;;  %2226 = vmatmul.mubr.bf16.vlgmr.msra.gmra.mrb[64].mxu0 %v3407_v16  ;;  %v3488_v16 = vld [vmem:[#allocation3 + $0x1a8] ss:$16 sps:$4 sm:$0xff]   ;;  %v3489_v17 = vld [vmem:[#allocation3 + $0x2c4] ss:$16 sps:$4 sm:$0xff]  }
 0x17c   :  { %2008 = vmatprep.mubr.bf16.mxu1 %v3411_v19  ;;  %2233 = vmatprep.mubr.bf16.mxu0 %v3413_v20  ;;  %v3493_v19 = vld [vmem:[#allocation3 + $0x2c0] ss:$16 sps:$4 sm:$0xff]   ;;  %v3494_v20 = vld [vmem:[#allocation3 + $0x1c8] ss:$16 sps:$4 sm:$0xff]  }
 0x17e   :  { %1251 = vperm.xlu1 %3348, %v941_v30   ;;  %v3509_v30 = vld [vmem:[#allocation3 + $0x22c] ss:$16 sps:$4 sm:$0xff]  }
 0x182   :  { %1181 = vperm.xlu1 %3348, %v927_v34   ;;  %v3515_v34 = vld [vmem:[#allocation3 + $0x24c] ss:$16 sps:$4 sm:$0xff]  }
 0x183   :  { %2009 = vmatmul.mubr.bf16.gmra.mrb[36].mxu1 %v3415_v23  ;;  %2234 = vmatmul.mubr.bf16.gmra.mrb[68].mxu0 %v3416_v24  ;;  %v3500_v23 = vld [vmem:[#allocation3 + $0x1e8] ss:$16 sps:$4 sm:$0xff]   ;;  %v3501_v24 = vld [vmem:[#allocation3 + $0x304] ss:$16 sps:$4 sm:$0xff]  }
 0x184   :  { %2016 = vmatprep.mubr.bf16.mxu1 %v3417_v26  ;;  %2241 = vmatprep.mubr.bf16.mxu0 %v3419_v27  ;;  %v3505_v26 = vld [vmem:[#allocation3 + $0x300] ss:$16 sps:$4 sm:$0xff]   ;;  %v3506_v27 = vld [vmem:[#allocation3 + $0x208] ss:$16 sps:$4 sm:$0xff]  }
 0x186   :  { %1261 = vperm.xlu1 %3348, %v943_v38   ;;  %v3521_v38 = vld [vmem:[#allocation3 + $0x26c] ss:$16 sps:$4 sm:$0xff]  }
 0x18b   :  { %2017 = vmatmul.mubr.bf16.gmra.mrb[40].mxu1 %v3421_v32  ;;  %2242 = vmatmul.mubr.bf16.gmra.mrb[72].mxu0 %v3422_v33  ;;  %v3512_v32 = vld [vmem:[#allocation3 + $0x228] ss:$16 sps:$4 sm:$0xff]   ;;  %v3513_v33 = vld [vmem:[#allocation3 + $0x344] ss:$16 sps:$4 sm:$0xff]  }
 0x18c   :  { %2024 = vmatprep.mubr.bf16.mxu1 %v3423_v35  ;;  %2249 = vmatprep.mubr.bf16.mxu0 %v3425_v36  ;;  %v3517_v35 = vld [vmem:[#allocation3 + $0x340] ss:$16 sps:$4 sm:$0xff]   ;;  %v3518_v36 = vld [vmem:[#allocation3 + $0x248] ss:$16 sps:$4 sm:$0xff]  }
 0x193   :  { %2025 = vmatmul.mubr.bf16.gmra.mrb[44].mxu1 %v3427_v39  ;;  %2250 = vmatmul.mubr.bf16.gmra.mrb[76].mxu0 %v3428_v40  ;;  %v3523_v40 = vld [vmem:[#allocation3 + $0x360] ss:$16 sps:$4 sm:$0xff]  }
 0x194   :  { %2032 = vmatprep.mubr.bf16.mxu1 %v3429_v41  ;;  %2257 = vmatprep.mubr.bf16.mxu0 %v3431_v42  ;;  %v3524_v41 = vld [vmem:[#allocation3 + $0x268] ss:$16 sps:$4 sm:$0xff]  }
 0x19b   :  { %2033 = vmatmul.mubr.bf16.gmra.mrb[48].mxu1 %v3433_v43  ;;  %2258 = vmatmul.mubr.bf16.gmra.mrb[80].mxu0 %v3434_v44  ;;  %v3525_v43 = vld [vmem:[#allocation3 + $0x384] ss:$16 sps:$4 sm:$0xff]   ;;  %v3527_v44 = vld [vmem:[#allocation3 + $0x28c] ss:$16 sps:$4 sm:$0xff]  }
 0x19c   :  { %2040 = vmatprep.mubr.bf16.mxu1 %v3435_v45  ;;  %2265 = vmatprep.mubr.bf16.mxu0 %v3437_v46 }
 0x1a3   :  { %2041 = vmatmul.mubr.bf16.gmra.mrb[52].mxu1 %v3439_v47  ;;  %2266 = vmatmul.mubr.bf16.gmra.mrb[84].mxu0 %v3440_v48  ;;  %v3529_v48 = vld [vmem:[#allocation3 + $0x380] ss:$16 sps:$4 sm:$0xff]  }
 0x1a4   :  { %2048 = vmatprep.mubr.bf16.mxu1 %v3441_v49  ;;  %2273 = vmatprep.mubr.bf16.mxu0 %v3443_v50  ;;  %v3530_v49 = vld [vmem:[#allocation3 + $0x288] ss:$16 sps:$4 sm:$0xff]  }
 0x1ab   :  { %2049 = vmatmul.mubr.bf16.gmra.mrb[56].mxu1 %v3445_v51  ;;  %2274 = vmatmul.mubr.bf16.gmra.mrb[88].mxu0 %v3446_v52  ;;  %v3531_v51 = vld [vmem:[#allocation3 + $0x3a4] ss:$16 sps:$4 sm:$0xff]   ;;  %v3533_v52 = vld [vmem:[#allocation3 + $0x2ac] ss:$16 sps:$4 sm:$0xff]  }
 0x1ac   :  { %2056 = vmatprep.mubr.bf16.mxu1 %v3447_v53  ;;  %2281 = vmatprep.mubr.bf16.mxu0 %v3449_v54 }
 0x1b3   :  { %2057 = vmatmul.mubr.bf16.gmra.mrb[60].mxu1 %v3451_v55  ;;  %2282 = vmatmul.mubr.bf16.gmra.mrb[92].mxu0 %v3452_v56  ;;  %v4063_v55 = vpop.permute.xlu0 %1026  ;;  %v4065_v56 = vpop.permute.xlu1 %946 }
 0x1b4   :  { %2064 = vmatprep.mubr.bf16.mxu1 %v3453_v57  ;;  %2289 = vmatprep.mubr.bf16.mxu0 %v3455_v58  ;;  %v3535_v58 = vld [vmem:[#allocation3 + $0x3a0] ss:$16 sps:$4 sm:$0xff]  }
 0x1bb   :  { %2065 = vmatmul.mubr.bf16.gmra.mrb[64].mxu1 %v3457_v59  ;;  %2290 = vmatmul.mubr.bf16.gmra.mrb[96].mxu0 %v3458_v60  ;;  %v3536_v59 = vld [vmem:[#allocation3 + $0x2a8] ss:$16 sps:$4 sm:$0xff]  }
 0x1bc   :  { %2072 = vmatprep.mubr.bf16.mxu1 %v3459_v61  ;;  %2297 = vmatprep.mubr.bf16.mxu0 %v3461_v62  ;;  %v3537_v61 = vld [vmem:[#allocation3 + $0x3c4] ss:$16 sps:$4 sm:$0xff]   ;;  %v3539_v62 = vld [vmem:[#allocation3 + $0x2cc] ss:$16 sps:$4 sm:$0xff]  }
 0x1c3   :  { %2073 = vmatmul.mubr.bf16.gmra.mrb[68].mxu1 %v3463_v63  ;;  %2298 = vmatmul.mubr.bf16.gmra.mrb[100].mxu0 %v3464_v0 }
 0x1c4   :  { %2080 = vmatprep.mubr.bf16.mxu1 %v3465_v1  ;;  %2305 = vmatprep.mubr.bf16.mxu0 %v3467_v2  ;;  %v4071_v1 = vpop.permute.xlu0 %1031  ;;  %v4073_v2 = vpop.permute.xlu1 %951 }
 0x1cb   :  { %2081 = vmatmul.mubr.bf16.gmra.mrb[72].mxu1 %v3469_v3  ;;  %2306 = vmatmul.mubr.bf16.gmra.mrb[104].mxu0 %v3470_v4  ;;  %v3541_v4 = vld [vmem:[#allocation3 + $0x3c0] ss:$16 sps:$4 sm:$0xff]  }
 0x1cc   :  { %2088 = vmatprep.mubr.bf16.mxu1 %v3471_v5  ;;  %2313 = vmatprep.mubr.bf16.mxu0 %v3473_v6  ;;  %v3542_v5 = vld [vmem:[#allocation3 + $0x2c8] ss:$16 sps:$4 sm:$0xff]  }
 0x1d3   :  { %2089 = vmatmul.mubr.bf16.gmra.mrb[76].mxu1 %v3475_v7  ;;  %2314 = vmatmul.mubr.bf16.gmra.mrb[108].mxu0 %v3476_v8  ;;  %v4077_v7 = vpop.permute.xlu0 %1036  ;;  %v3543_v8 = vld [vmem:[#allocation3 + $0x3e4] ss:$16 sps:$4 sm:$0xff]  }
 0x1d4   :  { %2096 = vmatprep.mubr.bf16.mxu1 %v3477_v9  ;;  %2321 = vmatprep.mubr.bf16.mxu0 %v3479_v10  ;;  %v3545_v9 = vld [vmem:[#allocation3 + $0x2ec] ss:$16 sps:$4 sm:$0xff]  }
 0x1db   :  { %2097 = vmatmul.mubr.bf16.gmra.mrb[80].mxu1 %v3481_v11  ;;  %2322 = vmatmul.mubr.bf16.gmra.mrb[112].mxu0 %v3482_v12  ;;  %v4081_v11 = vpop.permute.xlu1 %1041 }
 0x1dc   :  { %2104 = vmatprep.mubr.bf16.mxu1 %v3483_v13  ;;  %2329 = vmatprep.mubr.bf16.mxu0 %v3485_v14  ;;  %v4083_v13 = vpop.permute.xlu0 %956 }
 0x1e3   :  { %2105 = vmatmul.mubr.bf16.gmra.mrb[84].mxu1 %v3487_v15  ;;  %2330 = vmatmul.mubr.bf16.gmra.mrb[116].mxu0 %v3488_v16  ;;  %v4087_v15 = vpop.permute.xlu1 %961  ;;  %v3547_v16 = vld [vmem:[#allocation3 + $0x3e0] ss:$16 sps:$4 sm:$0xff]  }
 0x1e4   :  { %2112 = vmatprep.mubr.bf16.mxu1 %v3489_v17  ;;  %2337 = vmatprep.mubr.bf16.mxu0 %v3491_v18  ;;  %v3548_v17 = vld [vmem:[#allocation3 + $0x2e8] ss:$16 sps:$4 sm:$0xff]  }
 0x1eb   :  { %2113 = vmatmul.mubr.bf16.gmra.mrb[88].mxu1 %v3493_v19  ;;  %2338 = vmatmul.mubr.bf16.gmra.mrb[120].mxu0 %v3494_v20  ;;  %v3549_v19 = vld [vmem:[#allocation3 + $0x30c] ss:$16 sps:$4 sm:$0xff]  }
 0x1ec   :  { %2120 = vmatprep.mubr.bf16.mxu1 %v3495_v21  ;;  %2345 = vmatprep.mubr.bf16.mxu0 %v3497_v29  ;;  %v3553_v20 = vld [vmem:[#allocation3 + $0x32c] ss:$16 sps:$4 sm:$0xff]  }
 0x1f3   :  { %2121 = vmatmul.mubr.bf16.gmra.mrb[92].mxu1 %v3499_v22  ;;  %2346 = vmatmul.mubr.bf16.gmra.mrb[124].mxu0 %v3500_v23  ;;  %v4091_v22 = vpop.permute.xlu0 %1046  ;;  %v4093_v23 = vpop.permute.xlu1 %1051 }
 0x1f4   :  { %2128 = vmatprep.mubr.bf16.mxu1 %v3501_v24  ;;  %2353 = vmatprep.mubr.bf16.mxu0 %v3503_v25  ;;  %v3551_v25 = vld [vmem:[#allocation3 + $0x328] ss:$16 sps:$4 sm:$0xff]  }
 0x1fb   :  { %2129 = vmatmul.mubr.bf16.gmra.mrb[96].mxu1 %v3505_v26  ;;  %2354 = vmatmul.mubr.bf16.gmra.mrb[128].mxu0 %v3506_v27  ;;  %v3554_v26 = vld [vmem:[#allocation3 + $0x308] ss:$16 sps:$4 sm:$0xff]  }
 0x1fc   :  { %2136 = vmatprep.mubr.bf16.mxu1 %v3507_v28  ;;  %2361 = vmatprep.mubr.bf16.mxu0 %v3509_v30  ;;  %v3555_v28 = vld [vmem:[#allocation3 + $0x34c] ss:$16 sps:$4 sm:$0xff]  }
 0x203   :  { %2137 = vmatmul.mubr.bf16.gmra.mrb[100].mxu1 %v3511_v31  ;;  %2362 = vmatmul.mubr.bf16.gmra.mrb[132].mxu0 %v3512_v32  ;;  %v4099_v32 = vpop.permute.xlu0 %966 }
 0x204   :  { %2144 = vmatprep.mubr.bf16.mxu1 %v3513_v33  ;;  %2369 = vmatprep.mubr.bf16.mxu0 %v3515_v34  ;;  %v4101_v33 = vpop.permute.xlu1 %971 }
 0x20b   :  { %2145 = vmatmul.mubr.bf16.gmra.mrb[104].mxu1 %v3517_v35  ;;  %2370 = vmatmul.mubr.bf16.gmra.mrb[136].mxu0 %v3518_v36  ;;  %v3557_v35 = vld [vmem:[#allocation3 + $0x348] ss:$16 sps:$4 sm:$0xff]  }
 0x20c   :  { %2152 = vmatprep.mubr.bf16.mxu1 %v3519_v37  ;;  %2377 = vmatprep.mubr.bf16.mxu0 %v3521_v38  ;;  %v4105_v37 = vpop.permute.xlu0 %1056  ;;  %v3558_v38 = vld [vmem:[#allocation3 + $0x36c] ss:$16 sps:$4 sm:$0xff]  }
 0x20e   :  { %v4055_v39 = vpop.f32.mrb[0].mxu1 }
 0x20f   :  { %v1940_v42 = vpop.f32.mrb[1].mxu1 }
 0x210   :  { %v4057_v45 = vpop.f32.mrb[2].mxu1 }
 0x211   :  { %v1943_v46 = vpop.f32.mrb[3].mxu1 }
 0x213   :  { %2153 = vmatmul.mubr.bf16.gmra.mrb[108].mxu1 %v3523_v40  ;;  %2378 = vmatmul.mubr.bf16.gmra.mrb[140].mxu0 %v3524_v41  ;;  %v4109_v41 = vpop.permute.xlu1 %1061 }
 0x214   :  { %2160 = vmatprep.mubr.bf16.mxu1 %v3525_v43  ;;  %2385 = vmatprep.mubr.bf16.mxu0 %v3527_v44  ;;  %v4111_v43 = vpop.permute.xlu0 %976 }
 0x216   :  { %v4059_v47 = vpop.f32.mrb[4].mxu1 }
 0x217   :  { %v1948_v50 = vpop.f32.mrb[5].mxu1  ;;  %v4115_v46 = vpop.permute.xlu1 %981 }
 0x218   :  { %v4061_v53 = vpop.f32.mrb[6].mxu1  ;;  %v3561_v50 = vld [vmem:[#allocation3 + $0x38c] ss:$16 sps:$4 sm:$0xff]  }
 0x219   :  { %v1951_v54 = vpop.f32.mrb[7].mxu1 }
 0x21b   :  { %2161 = vmatmul.mubr.bf16.gmra.mrb[112].mxu1 %v3529_v48  ;;  %2386 = vmatmul.mubr.bf16.gmra.mrb[144].mxu0 %v3530_v49  ;;  %v3560_v48 = vld [vmem:[#allocation3 + $0x368] ss:$16 sps:$4 sm:$0xff]  }
 0x21c   :  { %2168 = vmatprep.mubr.bf16.mxu1 %v3531_v51  ;;  %2393 = vmatprep.mubr.bf16.mxu0 %v3533_v52  ;;  %v2553_v52 = vlaneseq }
 0x21e   :  { %v4067_v57 = vpop.f32.mrb[8].mxu1 }
 0x21f   :  { %v1956_v60 = vpop.f32.mrb[9].mxu1 }
 0x220   :  { %v4069_v63 = vpop.f32.mrb[10].mxu1  ;;  %v4123_v60 = vpop.permute.xlu1 %1071 }
 0x221   :  { %v1959_v0 = vpop.f32.mrb[11].mxu1 }
 0x223   :  { %2169 = vmatmul.mubr.bf16.gmra.mrb[116].mxu1 %v3535_v58  ;;  %2394 = vmatmul.mubr.bf16.gmra.mrb[148].mxu0 %v3536_v59  ;;  %v4119_v58 = vshrl.u32 %v2553_v52, 7  ;;  %v4121_v59 = vpop.permute.xlu0 %1066  ;;  %v3567_v52 = vld [vmem:[#allocation3 + $0x3cc] ss:$16 sps:$4 sm:$0xff]  }
 0x224   :  { %2176 = vmatprep.mubr.bf16.mxu1 %v3537_v61  ;;  %2401 = vmatprep.mubr.bf16.mxu0 %v3539_v62  ;;  %v1939_v61 = vadd.f32 %v4055_v39, %v4065_v56  ;;  %v4130_v62 = vld [vmem:[%s4420_s4] sm:$0xf]  ;;  %s3629_s4 = smov [#allocation6]  }
 0x225   :  { %s2732_s13 = sshll.u32 %s3629_s4, 4  ;;  %s2733_s13 = int_to_ptr.vmem [resolvable:$true] %s2732_s13 }
 0x226   :  { %v4075_v3 = vpop.f32.mrb[12].mxu1  ;;  %s3599_s14 = scalar_lea.vmem %s2733_s13, 16  ;;  %s3603_s15 = scalar_lea.vmem %s2733_s13, 32 }
 0x227   :  { %v1964_v6 = vpop.f32.mrb[13].mxu1  ;;  %p3600_p8 = scmp.ne.s32.totalorder %s2733_s13, %s3599_s14  ;;  %p3604_p9 = scmp.lt.s32.totalorder %s2733_s13, %s2733_s13 }
 0x228   :  { %v4079_v10 = vpop.f32.mrb[14].mxu1  ;;  %v1942_v6 = vadd.f32 %v4057_v45, %v4073_v2  ;;  %v4142_v45 = vpop.permute.xlu1 %991  ;;  %v1947_v2 = vadd.f32 %v4059_v47, %v4083_v13  ;;  %p3605_p10 = scmp.lt.s32.totalorder %s3603_s15, %s3599_s14 }
 0x229   :  { %v1967_v12 = vpop.f32.mrb[15].mxu1 }
 0x22a   :  { %v3563_v12 = vld [vmem:[#allocation3 + $0x388] ss:$16 sps:$4 sm:$0xff]   ;;  %p3606_p11 = por %p3605_p10, %p3604_p9 }
 0x22b   :  { %2177 = vmatmul.mubr.bf16.gmra.mrb[120].mxu1 %v3541_v4  ;;  %2402 = vmatmul.mubr.bf16.gmra.mrb[152].mxu0 %v3542_v5  ;;  %v2564_v5 = vsub.s32 1, %v4119_v58 }
 0x22c   :  { %2184 = vmatprep.mubr.bf16.mxu1 %v3543_v8  ;;  %2409 = vmatprep.mubr.bf16.mxu0 %v3545_v9  ;;  %p3607_p12 = pnand %p3606_p11, %p3600_p8 }
 0x22d   :  { %v2565_v56 = vrot.slane %v4130_v62, %v2564_v5 }
 0x22e   :  { %v4085_v14 = vpop.f32.mrb[16].mxu1 }
 0x22f   :  { %v1972_v18 = vpop.f32.mrb[17].mxu1 }
 0x230   :  { %v4089_v21 = vpop.f32.mrb[18].mxu1  ;;  %v3564_v18 = vld [vmem:[#allocation3 + $0x3ac] ss:$16 sps:$4 sm:$0xff]  }
 0x231   :  { %v1975_v29 = vpop.f32.mrb[19].mxu1 }
 0x233   :  { %2185 = vmatmul.mubr.bf16.gmra.mrb[124].mxu1 %v3547_v16  ;;  %2410 = vmatmul.mubr.bf16.gmra.mrb[156].mxu0 %v3548_v17 }
 0x234   :  { %2417 = vmatprep.mubr.bf16.mxu0 %v3549_v19  ;;  %2425 = vmatprep.mubr.bf16.mxu1 %v3553_v20 }
 0x236   :  { %v4095_v24 = vpop.f32.mrb[20].mxu1 }
 0x237   :  { %v1980_v27 = vpop.f32.mrb[21].mxu1 }
 0x238   :  { %v4097_v30 = vpop.f32.mrb[22].mxu1  ;;  %v4140_v27 = vpop.permute.xlu0 %986 }
 0x239   :  { %v1983_v31 = vpop.f32.mrb[23].mxu1 }
 0x23b   :  { %2418 = vmatmul.mubr.bf16.gmra.mrb[160].mxu0 %v3554_v26  ;;  %2426 = vmatmul.mubr.bf16.vlgmr.msra.gmra.mrb[100].mxu1 %v3551_v25 }
 0x23c   :  { %2433 = vmatprep.mubr.bf16.mxu1 %v3555_v28  ;;  %2642 = vmatprep.mubr.f32.mxu0 %v2565_v56  ;;  %v3569_v56 = vld [vmem:[#allocation3 + $0x3c8] ss:$16 sps:$4 sm:$0xff]  }
 0x23e   :  { %v4103_v34 = vpop.f32.mrb[24].mxu1 }
 0x23f   :  { %v1988_v36 = vpop.f32.mrb[25].mxu1 }
 0x240   :  { %v4107_v40 = vpop.f32.mrb[26].mxu1  ;;  %v1950_v36 = vadd.f32 %v4061_v53, %v4087_v15  ;;  %v1955_v53 = vadd.f32 %v4067_v57, %v4099_v32 }
 0x241   :  { %v1991_v42 = vpop.f32.mrb[27].mxu1 }
 0x243   :  { %2434 = vmatmul.mubr.bf16.gmra.mrb[104].mxu1 %v3557_v35 }
 0x244   :  { %2441 = vmatprep.mubr.bf16.mxu1 %v3558_v38 }
 0x246   :  { %v4113_v44 = vpop.f32.mrb[28].mxu1 }
 0x247   :  { %v1996_v49 = vpop.f32.mrb[29].mxu1 }
 0x248   :  { %v4117_v51 = vpop.f32.mrb[30].mxu1 }
 0x249   :  { %v1999_v54 = vpop.f32.mrb[31].mxu1 }
 0x24b   :  { %2442 = vmatmul.mubr.bf16.gmra.mrb[108].mxu1 %v3560_v48  ;;  %v3566_v48 = vld [vmem:[#allocation3 + $0x3a8] ss:$16 sps:$4 sm:$0xff]  }
 0x24c   :  { %2449 = vmatprep.mubr.bf16.mxu1 %v3561_v50 }
 0x24e   :  { %v2227_v0 = vpop.f32.mrb[64].mxu0  ;;  %v4132_v4 = vpop.f32.mrb[32].mxu1 }
 0x24f   :  { %v2228_v8 = vadd.f32 %v2227_v0, %v1939_v61  ;;  %v2229_v9 = vpop.f32.mrb[65].mxu0  ;;  %v2004_v16 = vpop.f32.mrb[33].mxu1 }
 0x250   :  { %v2230_v17 = vpop.f32.mrb[66].mxu0  ;;  %v4137_v39 = vpop.f32.mrb[34].mxu1  ;;  %v1958_v16 = vadd.f32 %v4069_v63, %v4101_v33  ;;  %v1963_v63 = vadd.f32 %v4075_v3, %v4111_v43 }
 0x251   :  { %v2231_v19 = vadd.f32 %v2230_v17, %v1942_v6  ;;  %v2232_v20 = vpop.f32.mrb[67].mxu0  ;;  %v2007_v29 = vpop.f32.mrb[35].mxu1  ;;  %v2482_v25 = vmax.f32 %v2228_v8, 0.0 }
 0x252   :  { %v4154_v6 = vpop.permute.xlu0 %1076  ;;  %v4156_v8 = vpop.permute.xlu1 %1081  ;;  %v3570_v29 = vld [vmem:[#allocation3 + $0x3ec] ss:$16 sps:$4 sm:$0xff]  }
 0x253   :  { %v2483_v26 = vmax.f32 %v2231_v19, 0.0  ;;  %2450 = vmatmul.mubr.bf16.gmra.mrb[112].mxu1 %v3563_v12 }
 0x254   :  { %2457 = vmatprep.mubr.bf16.mxu1 %v3564_v18 }
 0x255   :  { %v4146_v28 = vpack.c.bf16 %v2483_v26, %v2482_v25 }
 0x256   :  { %v2235_v31 = vpop.f32.mrb[68].mxu0  ;;  %v4148_v35 = vpop.f32.mrb[36].mxu1 }
 0x257   :  { %v2236_v38 = vadd.f32 %v2235_v31, %v1947_v2  ;;  %v2237_v42 = vpop.f32.mrb[69].mxu0  ;;  %v2012_v49 = vpop.f32.mrb[37].mxu1 }
 0x258   :  { %v2238_v50 = vpop.f32.mrb[70].mxu0  ;;  %v4152_v54 = vpop.f32.mrb[38].mxu1  ;;  %v1966_v49 = vadd.f32 %v4079_v10, %v4115_v46  ;;  %v1971_v10 = vadd.f32 %v4085_v14, %v4140_v27 }
 0x259   :  { %v2239_v61 = vadd.f32 %v2238_v50, %v1950_v36  ;;  %v2240_v0 = vpop.f32.mrb[71].mxu0  ;;  %v2015_v5 = vpop.f32.mrb[39].mxu1  ;;  %v2484_v47 = vmax.f32 %v2236_v38, 0.0 }
 0x25a   :  { %v997_v36 = vpop.permute.xlu0 %996  ;;  %v1002_v38 = vpop.permute.xlu1 %1001 }
 0x25b   :  { %v2485_v13 = vmax.f32 %v2239_v61, 0.0  ;;  %2458 = vmatmul.mubr.bf16.gmra.mrb[116].mxu1 %v3566_v48  ;;  %v3572_v61 = vld [vmem:[#allocation3 + $0x3e8] ss:$16 sps:$4 sm:$0xff]  }
 0x25c   :  { %2465 = vmatprep.mubr.bf16.mxu1 %v3567_v52 }
 0x25d   :  { %v4160_v15 = vpack.c.bf16 %v2485_v13, %v2484_v47 }
 0x25e   :  { %v2243_v9 = vpop.f32.mrb[72].mxu0  ;;  %v4162_v12 = vpop.f32.mrb[40].mxu1 }
 0x25f   :  { %v2244_v17 = vadd.f32 %v2243_v9, %v1955_v53  ;;  %v2245_v18 = vpop.f32.mrb[73].mxu0  ;;  %v2020_v19 = vpop.f32.mrb[41].mxu1 }
 0x260   :  { %v2246_v20 = vpop.f32.mrb[74].mxu0  ;;  %v4166_v25 = vpop.f32.mrb[42].mxu1  ;;  %v1974_v19 = vadd.f32 %v4089_v21, %v4142_v45  ;;  %v1982_v21 = vadd.f32 %v4097_v30, %v1002_v38 }
 0x261   :  { %v2247_v26 = vadd.f32 %v2246_v20, %v1958_v16  ;;  %v2248_v2 = vpop.f32.mrb[75].mxu0  ;;  %v2023_v31 = vpop.f32.mrb[43].mxu1  ;;  %v2486_v57 = vmax.f32 %v2244_v17, 0.0 }
 0x262   :  { %v4178_v43 = vpop.permute.xlu0 %1086  ;;  %v4180_v17 = vpop.permute.xlu1 %1091 }
 0x263   :  { %v2487_v32 = vmax.f32 %v2247_v26, 0.0  ;;  %2466 = vmatmul.mubr.bf16.gmra.mrb[120].mxu1 %v3569_v56 }
 0x264   :  { %2473 = vmatprep.mubr.bf16.mxu1 %v3570_v29 }
 0x265   :  { %v4170_v33 = vpack.c.bf16 %v2487_v32, %v2486_v57 }
 0x266   :  { %v2251_v42 = vpop.f32.mrb[76].mxu0  ;;  %v4172_v48 = vpop.f32.mrb[44].mxu1 }
 0x267   :  { %v2252_v50 = vadd.f32 %v2251_v42, %v1963_v63  ;;  %v2253_v52 = vpop.f32.mrb[77].mxu0  ;;  %v2028_v0 = vpop.f32.mrb[45].mxu1 }
 0x268   :  { %v2254_v5 = vpop.f32.mrb[78].mxu0  ;;  %v4176_v47 = vpop.f32.mrb[46].mxu1 }
 0x269   :  { %v2255_v13 = vadd.f32 %v2254_v5, %v1966_v49  ;;  %v2256_v53 = vpop.f32.mrb[79].mxu0  ;;  %v2031_v9 = vpop.f32.mrb[47].mxu1  ;;  %v2488_v16 = vmax.f32 %v2252_v50, 0.0  ;;  %v1979_v50 = vadd.f32 %v4095_v24, %v997_v36 }
 0x26a   :  { %v1007_v14 = vpop.permute.xlu0 %1006  ;;  %v1012_v27 = vpop.permute.xlu1 %1011 }
 0x26b   :  { %v2489_v3 = vmax.f32 %v2255_v13, 0.0  ;;  %2474 = vmatmul.mubr.bf16.gmra.mrb[124].mxu1 %v3572_v61  ;;  %v1987_v36 = vadd.f32 %v4103_v34, %v1007_v14 }
 0x26d   :  { %v4184_v46 = vpack.c.bf16 %v2489_v3, %v2488_v16 }
 0x26e   :  { %v2259_v18 = vpop.f32.mrb[80].mxu0  ;;  %v4186_v56 = vpop.f32.mrb[48].mxu1 }
 0x26f   :  { %v2260_v20 = vadd.f32 %v2259_v18, %v1971_v10  ;;  %v2261_v29 = vpop.f32.mrb[81].mxu0  ;;  %v2036_v26 = vpop.f32.mrb[49].mxu1 }
 0x270   :  { %v2262_v2 = vpop.f32.mrb[82].mxu0  ;;  %v4190_v31 = vpop.f32.mrb[50].mxu1  ;;  %v1990_v26 = vadd.f32 %v4107_v40, %v1012_v27 }
 0x271   :  { %v2263_v57 = vadd.f32 %v2262_v2, %v1974_v19  ;;  %v2264_v32 = vpop.f32.mrb[83].mxu0  ;;  %v2039_v63 = vpop.f32.mrb[51].mxu1  ;;  %v2490_v42 = vmax.f32 %v2260_v20, 0.0 }
 0x272   :  { %v4200_v20 = vpop.permute.xlu0 %1096  ;;  %v4202_v24 = vpop.permute.xlu1 %1101 }
 0x273   :  { %v2491_v49 = vmax.f32 %v2263_v57, 0.0 }
 0x275   :  { %v4193_v52 = vpack.c.bf16 %v2491_v49, %v2490_v42 }
 0x276   :  { %v2267_v61 = vpop.f32.mrb[84].mxu0  ;;  %v4195_v0 = vpop.f32.mrb[52].mxu1 }
 0x277   :  { %v2268_v45 = vadd.f32 %v2267_v61, %v1979_v50  ;;  %v2269_v5 = vpop.f32.mrb[85].mxu0  ;;  %v2044_v13 = vpop.f32.mrb[53].mxu1 }
 0x278   :  { %v2270_v53 = vpop.f32.mrb[86].mxu0  ;;  %v4198_v9 = vpop.f32.mrb[54].mxu1 }
 0x279   :  { %v2271_v16 = vadd.f32 %v2270_v53, %v1982_v21  ;;  %v2272_v3 = vpop.f32.mrb[87].mxu0  ;;  %v2047_v10 = vpop.f32.mrb[55].mxu1  ;;  %v2492_v18 = vmax.f32 %v2268_v45, 0.0 }
 0x27a   :  { %v1017_v21 = vpop.permute.xlu0 %1016  ;;  %v1022_v34 = vpop.permute.xlu1 %1021 }
 0x27b   :  { %v2493_v19 = vmax.f32 %v2271_v16, 0.0  ;;  %v1995_v14 = vadd.f32 %v4113_v44, %v1017_v21  ;;  %v1998_v40 = vadd.f32 %v4117_v51, %v1022_v34  ;;  %v2003_v44 = vadd.f32 %v4132_v4, %v4063_v55 }
 0x27c   :  { %v2006_v51 = vadd.f32 %v4137_v39, %v4071_v1  ;;  %v2011_v55 = vadd.f32 %v4148_v35, %v4077_v7  ;;  %v2014_v1 = vadd.f32 %v4152_v54, %v4081_v11  ;;  %v2022_v54 = vadd.f32 %v4166_v25, %v4093_v23 }
 0x27d   :  { %v4205_v29 = vpack.c.bf16 %v2493_v19, %v2492_v18  ;;  %v2027_v23 = vadd.f32 %v4172_v48, %v4105_v37 }
 0x27e   :  { %v2275_v30 = vpop.f32.mrb[88].mxu0  ;;  %v4207_v38 = vpop.f32.mrb[56].mxu1 }
 0x27f   :  { %v2276_v2 = vadd.f32 %v2275_v30, %v1987_v36  ;;  %v2277_v57 = vpop.f32.mrb[89].mxu0  ;;  %v2052_v32 = vpop.f32.mrb[57].mxu1 }
 0x280   :  { %v2278_v63 = vpop.f32.mrb[90].mxu0  ;;  %v4210_v42 = vpop.f32.mrb[58].mxu1 }
 0x281   :  { %v2279_v49 = vadd.f32 %v2278_v63, %v1990_v26  ;;  %v2280_v50 = vpop.f32.mrb[91].mxu0  ;;  %v2055_v61 = vpop.f32.mrb[59].mxu1  ;;  %v2494_v45 = vmax.f32 %v2276_v2, 0.0 }
 0x283   :  { %v2495_v5 = vmax.f32 %v2279_v49, 0.0 }
 0x285   :  { %v4213_v13 = vpack.c.bf16 %v2495_v5, %v2494_v45 }
 0x286   :  { %v2283_v53 = vpop.f32.mrb[92].mxu0  ;;  %v4215_v16 = vpop.f32.mrb[60].mxu1 }
 0x287   :  { %v2284_v27 = vadd.f32 %v2283_v53, %v1995_v14  ;;  %v2285_v3 = vpop.f32.mrb[93].mxu0  ;;  %v2060_v10 = vpop.f32.mrb[61].mxu1 }
 0x288   :  { %v2286_v18 = vpop.f32.mrb[94].mxu0  ;;  %v4218_v19 = vpop.f32.mrb[62].mxu1 }
 0x289   :  { %v2287_v36 = vadd.f32 %v2286_v18, %v1998_v40  ;;  %v2288_v30 = vpop.f32.mrb[95].mxu0  ;;  %v2063_v26 = vpop.f32.mrb[63].mxu1  ;;  %v2496_v2 = vmax.f32 %v2284_v27, 0.0 }
 0x28b   :  { %v2497_v57 = vmax.f32 %v2287_v36, 0.0 }
 0x28d   :  { %v4222_v32 = vpack.c.bf16 %v2497_v57, %v2496_v2 }
 0x28e   :  { %v4224_v63 = vpop.f32.mrb[64].mxu1  ;;  %v2291_v49 = vpop.f32.mrb[96].mxu0 }
 0x28f   :  { %v2292_v50 = vadd.f32 %v2291_v49, %v2003_v44  ;;  %v2068_v61 = vpop.f32.mrb[65].mxu1  ;;  %v2293_v21 = vpop.f32.mrb[97].mxu0  ;;  %v2019_v49 = vadd.f32 %v4162_v12, %v4091_v22 }
 0x290   :  { %v4228_v45 = vpop.f32.mrb[66].mxu1  ;;  %v2294_v5 = vpop.f32.mrb[98].mxu0 }
 0x291   :  { %v2295_v34 = vadd.f32 %v2294_v5, %v2006_v51  ;;  %v2296_v14 = vpop.f32.mrb[99].mxu0  ;;  %v2071_v53 = vpop.f32.mrb[67].mxu1  ;;  %v2498_v40 = vmax.f32 %v2292_v50, 0.0 }
 0x293   :  { %v2499_v27 = vmax.f32 %v2295_v34, 0.0 }
 0x295   :  { %v3103_v4 = vpack.c.bf16 %v2499_v27, %v2498_v40  ;;  %v4248_v27 = vpop.permute.xlu0 %1186 }
 0x296   :  { %v4232_v3 = vpop.f32.mrb[68].mxu1  ;;  %v2299_v10 = vpop.f32.mrb[100].mxu0 }
 0x297   :  { %v2300_v39 = vadd.f32 %v2299_v10, %v2011_v55  ;;  %v2076_v18 = vpop.f32.mrb[69].mxu1  ;;  %v2301_v36 = vpop.f32.mrb[101].mxu0  ;;  %3104 = vmatprep.subr.bf16.mxu0 %v3103_v4 }
 0x298   :  { %v4236_v30 = vpop.f32.mrb[70].mxu1  ;;  %v2302_v26 = vpop.f32.mrb[102].mxu0  ;;  %3106 = vmatpush3.bf16.msra.mxu0 %v4146_v28 }
 0x299   :  { %v2303_v2 = vadd.f32 %v2302_v26, %v2014_v1  ;;  %v2079_v57 = vpop.f32.mrb[71].mxu1  ;;  %v2304_v44 = vpop.f32.mrb[103].mxu0  ;;  %v2500_v7 = vmax.f32 %v2300_v39, 0.0  ;;  %v2030_v1 = vadd.f32 %v4176_v47, %v4109_v41  ;;  %v2035_v41 = vadd.f32 %v4186_v56, %v4121_v59 }
 0x29a   :  { %v4250_v55 = vpop.permute.xlu1 %1191 }
 0x29b   :  { %v2501_v35 = vmax.f32 %v2303_v2, 0.0 }
 0x29d   :  { %v3107_v51 = vpack.c.bf16 %v2501_v35, %v2500_v7  ;;  %v4261_v7 = vpop.permute.xlu0 %1106 }
 0x29e   :  { %v4241_v50 = vpop.f32.mrb[72].mxu1  ;;  %v2307_v11 = vpop.f32.mrb[104].mxu0 }
 0x29f   :  { %v2308_v61 = vadd.f32 %v2307_v11, %v2019_v49  ;;  %v2084_v21 = vpop.f32.mrb[73].mxu1  ;;  %v2309_v5 = vpop.f32.mrb[105].mxu0  ;;  %3108 = vmatprep.subr.bf16.mxu0 %v3107_v51  ;;  %v2038_v11 = vadd.f32 %v4190_v31, %v4123_v60  ;;  %v2043_v60 = vadd.f32 %v4195_v0, %v4154_v6 }
 0x2a0   :  { %v4245_v28 = vpop.f32.mrb[74].mxu1  ;;  %v2310_v34 = vpop.f32.mrb[106].mxu0  ;;  %3110 = vmatpush3.bf16.msra.mxu0 %v4160_v15 }
 0x2a1   :  { %v2311_v14 = vadd.f32 %v2310_v34, %v2022_v54  ;;  %v2087_v53 = vpop.f32.mrb[75].mxu1  ;;  %v2312_v40 = vpop.f32.mrb[107].mxu0  ;;  %v2502_v22 = vmax.f32 %v2308_v61, 0.0 }
 0x2a2   :  { %v4263_v35 = vpop.permute.xlu1 %1111  ;;  %v4274_v40 = vpop.permute.xlu0 %1116 }
 0x2a3   :  { %v2503_v12 = vmax.f32 %v2311_v14, 0.0 }
 0x2a5   :  { %v3111_v25 = vpack.c.bf16 %v2503_v12, %v2502_v22 }
 0x2a6   :  { %v4254_v4 = vpop.f32.mrb[76].mxu1  ;;  %v2315_v10 = vpop.f32.mrb[108].mxu0 }
 0x2a7   :  { %v2316_v15 = vadd.f32 %v2315_v10, %v2027_v23  ;;  %v2092_v39 = vpop.f32.mrb[77].mxu1  ;;  %v2317_v18 = vpop.f32.mrb[109].mxu0  ;;  %3112 = vmatprep.subr.bf16.mxu0 %v3111_v25  ;;  %v2046_v25 = vadd.f32 %v4198_v9, %v4156_v8  ;;  %v2051_v8 = vadd.f32 %v4207_v38, %v4178_v43 }
 0x2a8   :  { %v4258_v36 = vpop.f32.mrb[78].mxu1  ;;  %v2318_v26 = vpop.f32.mrb[110].mxu0  ;;  %3114 = vmatpush3.bf16.msra.mxu0 %v4170_v33 }
 0x2a9   :  { %v2319_v2 = vadd.f32 %v2318_v26, %v2030_v1  ;;  %v2095_v57 = vpop.f32.mrb[79].mxu1  ;;  %v2320_v44 = vpop.f32.mrb[111].mxu0  ;;  %v2504_v37 = vmax.f32 %v2316_v15, 0.0 }
 0x2aa   :  { %v4276_v22 = vpop.permute.xlu1 %1121  ;;  %v4287_v57 = vpop.permute.xlu0 %1196 }
 0x2ab   :  { %v2505_v48 = vmax.f32 %v2319_v2, 0.0 }
 0x2ad   :  { %v3115_v47 = vpack.c.bf16 %v2505_v48, %v2504_v37 }
 0x2ae   :  { %v4267_v49 = vpop.f32.mrb[80].mxu1  ;;  %v2323_v51 = vpop.f32.mrb[112].mxu0 }
 0x2af   :  { %v2324_v33 = vadd.f32 %v2323_v51, %v2035_v41  ;;  %v2100_v54 = vpop.f32.mrb[81].mxu1  ;;  %v2325_v61 = vpop.f32.mrb[113].mxu0  ;;  %3116 = vmatprep.subr.bf16.mxu0 %v3115_v47  ;;  %v2054_v41 = vadd.f32 %v4210_v42, %v4180_v17 }
 0x2b0   :  { %v4271_v21 = vpop.f32.mrb[82].mxu1  ;;  %v2326_v5 = vpop.f32.mrb[114].mxu0  ;;  %3118 = vmatpush3.bf16.msra.mxu0 %v4184_v46 }
 0x2b1   :  { %v2327_v34 = vadd.f32 %v2326_v5, %v2038_v11  ;;  %v2103_v14 = vpop.f32.mrb[83].mxu1  ;;  %v2328_v53 = vpop.f32.mrb[115].mxu0  ;;  %v2506_v59 = vmax.f32 %v2324_v33, 0.0 }
 0x2b2   :  { %v4289_v44 = vpop.permute.xlu1 %1201  ;;  %v2059_v53 = vadd.f32 %v4215_v16, %v4200_v20 }
 0x2b3   :  { %v2507_v56 = vmax.f32 %v2327_v34, 0.0  ;;  %v1127_v34 = vpop.permute.xlu0 %1126 }
 0x2b5   :  { %v3119_v31 = vpack.c.bf16 %v2507_v56, %v2506_v59  ;;  %v2062_v56 = vadd.f32 %v4218_v19, %v4202_v24  ;;  %v2555_v24 = vsub.s32 0, %v4119_v58  ;;  %v2067_v19 = vadd.f32 %v4224_v63, %v4261_v7 }
 0x2b6   :  { %v4280_v12 = vpop.f32.mrb[84].mxu1  ;;  %v2331_v23 = vpop.f32.mrb[116].mxu0 }
 0x2b7   :  { %v2332_v46 = vadd.f32 %v2331_v23, %v2043_v60  ;;  %v2108_v10 = vpop.f32.mrb[85].mxu1  ;;  %v2333_v1 = vpop.f32.mrb[117].mxu0  ;;  %3120 = vmatprep.subr.bf16.mxu0 %v3119_v31 }
 0x2b8   :  { %v4284_v15 = vpop.f32.mrb[86].mxu1  ;;  %v2334_v39 = vpop.f32.mrb[118].mxu0  ;;  %3122 = vmatpush3.bf16.msra.mxu0 %v4193_v52 }
 0x2b9   :  { %v2335_v18 = vadd.f32 %v2334_v39, %v2046_v25  ;;  %v2111_v26 = vpop.f32.mrb[87].mxu1  ;;  %v2336_v2 = vpop.f32.mrb[119].mxu0  ;;  %v2508_v6 = vmax.f32 %v2332_v46, 0.0  ;;  %v2572_v39 = vsub.s32 3, %v4119_v58 }
 0x2ba   :  { %v1132_v14 = vpop.permute.xlu1 %1131 }
 0x2bb   :  { %v2509_v0 = vmax.f32 %v2335_v18, 0.0  ;;  %v4310_v18 = vpop.permute.xlu0 %1206  ;;  %v2573_v63 = vrot.slane %v4130_v62, %v2572_v39 }
 0x2bd   :  { %v3123_v9 = vpack.c.bf16 %v2509_v0, %v2508_v6  ;;  %v2561_v0 = vrot.slane %v4130_v62, %v2555_v24 }
 0x2be   :  { %v4293_v37 = vpop.f32.mrb[88].mxu1  ;;  %v2339_v48 = vpop.f32.mrb[120].mxu0 }
 0x2bf   :  { %v2340_v52 = vadd.f32 %v2339_v48, %v2051_v8  ;;  %v2116_v47 = vpop.f32.mrb[89].mxu1  ;;  %v2341_v51 = vpop.f32.mrb[121].mxu0  ;;  %3124 = vmatprep.subr.bf16.mxu0 %v3123_v9  ;;  %v2070_v8 = vadd.f32 %v4228_v45, %v4263_v35  ;;  %v2075_v45 = vadd.f32 %v4232_v3, %v4274_v40  ;;  %v2083_v3 = vadd.f32 %v4241_v50, %v1127_v34 }
 0x2c0   :  { %v4297_v11 = vpop.f32.mrb[90].mxu1  ;;  %v2342_v33 = vpop.f32.mrb[122].mxu0  ;;  %3126 = vmatpush3.bf16.msra.mxu0 %v4205_v29 }
 0x2c1   :  { %v2343_v54 = vadd.f32 %v2342_v33, %v2054_v41  ;;  %v2119_v61 = vpop.f32.mrb[91].mxu1  ;;  %v2344_v5 = vpop.f32.mrb[123].mxu0  ;;  %v2510_v43 = vmax.f32 %v2340_v52, 0.0 }
 0x2c2   :  { %v4312_v26 = vpop.permute.xlu1 %1211  ;;  %v1137_v5 = vpop.permute.xlu0 %1136 }
 0x2c3   :  { %v2511_v38 = vmax.f32 %v2343_v54, 0.0 }
 0x2c5   :  { %v3127_v17 = vpack.c.bf16 %v2511_v38, %v2510_v43 }
 0x2c6   :  { %v4302_v42 = vpop.f32.mrb[92].mxu1  ;;  %v2347_v59 = vpop.f32.mrb[124].mxu0 }
 0x2c7   :  { %v2348_v60 = vadd.f32 %v2347_v59, %v2059_v53  ;;  %v2124_v31 = vpop.f32.mrb[93].mxu1  ;;  %v2349_v29 = vpop.f32.mrb[125].mxu0  ;;  %3128 = vmatprep.subr.bf16.mxu0 %v3127_v17 }
 0x2c8   :  { %v4306_v23 = vpop.f32.mrb[94].mxu1  ;;  %v2350_v25 = vpop.f32.mrb[126].mxu0  ;;  %3130 = vmatpush3.bf16.msra.mxu0 %v4213_v13 }
 0x2c9   :  { %v2351_v46 = vadd.f32 %v2350_v25, %v2062_v56  ;;  %v2127_v10 = vpop.f32.mrb[95].mxu1  ;;  %v2352_v1 = vpop.f32.mrb[127].mxu0  ;;  %v2512_v20 = vmax.f32 %v2348_v60, 0.0 }
 0x2ca   :  { %v1142_v43 = vpop.permute.xlu1 %1141  ;;  %v4334_v31 = vpop.permute.xlu0 %1216  ;;  %v2086_v1 = vadd.f32 %v4245_v28, %v1132_v14 }
 0x2cb   :  { %v2513_v16 = vmax.f32 %v2351_v46, 0.0  ;;  %v2094_v34 = vadd.f32 %v4258_v36, %v1142_v43 }
 0x2cd   :  { %v3131_v2 = vpack.c.bf16 %v2513_v16, %v2512_v20 }
 0x2ce   :  { %v4317_v6 = vpop.f32.mrb[96].mxu1  ;;  %v2355_v13 = vpop.f32.mrb[128].mxu0 }
 0x2cf   :  { %v2356_v9 = vadd.f32 %v2355_v13, %v2067_v19  ;;  %v2132_v48 = vpop.f32.mrb[97].mxu1  ;;  %v2357_v41 = vpop.f32.mrb[129].mxu0  ;;  %3132 = vmatprep.subr.bf16.mxu0 %v3131_v2 }
 0x2d0   :  { %v4324_v52 = vpop.f32.mrb[98].mxu1  ;;  %v2358_v47 = vpop.f32.mrb[130].mxu0  ;;  %3134 = vmatpush3.bf16.msra.mxu0 %v4222_v32  ;;  %v2078_v32 = vadd.f32 %v4236_v30, %v4276_v22 }
 0x2d1   :  { %v2359_v7 = vadd.f32 %v2358_v47, %v2070_v8  ;;  %v2360_v51 = vpop.f32.mrb[131].mxu0  ;;  %v2135_v33 = vpop.f32.mrb[99].mxu1  ;;  %v2514_v54 = vmax.f32 %v2356_v9, 0.0  ;;  %v2091_v8 = vadd.f32 %v4254_v4, %v1137_v5 }
 0x2d2   :  { %v4336_v46 = vpop.permute.xlu1 %1221  ;;  %v1147_v22 = vpop.permute.xlu0 %1146 }
 0x2d3   :  { %v2515_v61 = vmax.f32 %v2359_v7, 0.0  ;;  %2643 = vmatmul.mubr.f32.vlgmr.msra.gmra.mrb[164].mxu0 %v2561_v0 }
 0x2d4   :  { %2712 = vmatprep.mubr.f32.mxu0 %v2573_v63 }
 0x2d5   :  { %v4330_v35 = vpack.c.bf16 %v2515_v61, %v2514_v54  ;;  %v2099_v61 = vadd.f32 %v4267_v49, %v1147_v22 }
 0x2d6   :  { %v2363_v38 = vpop.f32.mrb[132].mxu0  ;;  %v1152_v2 = vpop.permute.xlu1 %1151 }
 0x2d7   :  { %v2364_v53 = vadd.f32 %v2363_v38, %v2075_v45  ;;  %v2365_v17 = vpop.f32.mrb[133].mxu0  ;;  %v4345_v48 = vpop.permute.xlu0 %1226  ;;  %v2102_v38 = vadd.f32 %v4271_v21, %v1152_v2 }
 0x2d8   :  { %v2366_v59 = vpop.f32.mrb[134].mxu0 }
 0x2d9   :  { %v2367_v56 = vadd.f32 %v2366_v59, %v2078_v32  ;;  %v2368_v60 = vpop.f32.mrb[135].mxu0  ;;  %v2516_v29 = vmax.f32 %v2364_v53, 0.0 }
 0x2da   :  { %v4348_v14 = vpop.permute.xlu1 %1231 }
 0x2db   :  { %v2517_v25 = vmax.f32 %v2367_v56, 0.0  ;;  %v1157_v54 = vpop.permute.xlu0 %1156 }
 0x2dd   :  { %v4339_v40 = vpack.c.bf16 %v2517_v25, %v2516_v29  ;;  %v2107_v25 = vadd.f32 %v4280_v12, %v1157_v54 }
 0x2de   :  { %v2371_v10 = vpop.f32.mrb[136].mxu0  ;;  %v1162_v5 = vpop.permute.xlu1 %1161 }
 0x2df   :  { %v2372_v20 = vadd.f32 %v2371_v10, %v2083_v3  ;;  %v2373_v30 = vpop.f32.mrb[137].mxu0  ;;  %v4354_v59 = vpop.permute.xlu0 %1236  ;;  %v2110_v10 = vadd.f32 %v4284_v15, %v1162_v5 }
 0x2e0   :  { %v2374_v16 = vpop.f32.mrb[138].mxu0 }
 0x2e1   :  { %v2375_v39 = vadd.f32 %v2374_v16, %v2086_v1  ;;  %v2376_v19 = vpop.f32.mrb[139].mxu0  ;;  %v2518_v13 = vmax.f32 %v2372_v20, 0.0 }
 0x2e2   :  { %v4356_v29 = vpop.permute.xlu1 %1241 }
 0x2e3   :  { %v2519_v0 = vmax.f32 %v2375_v39, 0.0  ;;  %v1167_v20 = vpop.permute.xlu0 %1166 }
 0x2e5   :  { %v4343_v9 = vpack.c.bf16 %v2519_v0, %v2518_v13  ;;  %v2115_v13 = vadd.f32 %v4293_v37, %v1167_v20 }
 0x2e6   :  { %v2379_v50 = vpop.f32.mrb[140].mxu0  ;;  %v1172_v39 = vpop.permute.xlu1 %1171 }
 0x2e7   :  { %v2380_v41 = vadd.f32 %v2379_v50, %v2091_v8  ;;  %v2381_v28 = vpop.f32.mrb[141].mxu0  ;;  %v4365_v8 = vpop.permute.xlu0 %1246  ;;  %v2118_v50 = vadd.f32 %v4297_v11, %v1172_v39 }
 0x2e8   :  { %v2382_v47 = vpop.f32.mrb[142].mxu0 }
 0x2e9   :  { %v2383_v63 = vadd.f32 %v2382_v47, %v2094_v34  ;;  %v2384_v7 = vpop.f32.mrb[143].mxu0  ;;  %v2520_v51 = vmax.f32 %v2380_v41, 0.0 }
 0x2ea   :  { %v4368_v41 = vpop.permute.xlu1 %1251 }
 0x2eb   :  { %v2521_v33 = vmax.f32 %v2383_v63, 0.0 }
 0x2ed   :  { %v4351_v4 = vpack.c.bf16 %v2521_v33, %v2520_v51  ;;  %v1177_v33 = vpop.permute.xlu0 %1176 }
 0x2ee   :  { %v2387_v45 = vpop.f32.mrb[144].mxu0  ;;  %v2123_v54 = vadd.f32 %v4302_v42, %v1177_v33 }
 0x2ef   :  { %v2388_v32 = vadd.f32 %v2387_v45, %v2099_v61  ;;  %v2389_v36 = vpop.f32.mrb[145].mxu0  ;;  %v1182_v61 = vpop.permute.xlu1 %1181 }
 0x2f0   :  { %v2390_v43 = vpop.f32.mrb[146].mxu0  ;;  %v2126_v45 = vadd.f32 %v4306_v23, %v1182_v61 }
 0x2f1   :  { %v2391_v53 = vadd.f32 %v2390_v43, %v2102_v38  ;;  %v2392_v17 = vpop.f32.mrb[147].mxu0  ;;  %v2522_v56 = vmax.f32 %v2388_v32, 0.0 }
 0x2f3   :  { %v2523_v60 = vmax.f32 %v2391_v53, 0.0 }
 0x2f5   :  { %v4359_v49 = vpack.c.bf16 %v2523_v60, %v2522_v56  ;;  %v2131_v56 = vadd.f32 %v4317_v6, %v4248_v27 }
 0x2f6   :  { %v2395_v3 = vpop.f32.mrb[148].mxu0 }
 0x2f7   :  { %v2396_v1 = vadd.f32 %v2395_v3, %v2107_v25  ;;  %v2397_v21 = vpop.f32.mrb[149].mxu0  ;;  %v2134_v3 = vadd.f32 %v4324_v52, %v4250_v55 }
 0x2f8   :  { %v2398_v30 = vpop.f32.mrb[150].mxu0 }
 0x2f9   :  { %v2399_v22 = vadd.f32 %v2398_v30, %v2110_v10  ;;  %v2400_v16 = vpop.f32.mrb[151].mxu0  ;;  %v2524_v19 = vmax.f32 %v2396_v1, 0.0 }
 0x2fb   :  { %v2525_v2 = vmax.f32 %v2399_v22, 0.0 }
 0x2fd   :  { %v4363_v0 = vpack.c.bf16 %v2525_v2, %v2524_v19 }
 0x2fe   :  { %v2403_v12 = vpop.f32.mrb[152].mxu0 }
 0x2ff   :  { %v2404_v34 = vadd.f32 %v2403_v12, %v2115_v13  ;;  %v2405_v15 = vpop.f32.mrb[153].mxu0 }
 0x300   :  { %v2406_v28 = vpop.f32.mrb[154].mxu0 }
 0x301   :  { %v2407_v47 = vadd.f32 %v2406_v28, %v2118_v50  ;;  %v2408_v63 = vpop.f32.mrb[155].mxu0  ;;  %v2526_v7 = vmax.f32 %v2404_v34, 0.0 }
 0x303   :  { %v2527_v51 = vmax.f32 %v2407_v47, 0.0 }
 0x305   :  { %v4371_v37 = vpack.c.bf16 %v2527_v51, %v2526_v7 }
 0x306   :  { %v2411_v5 = vpop.f32.mrb[156].mxu0 }
 0x307   :  { %v2412_v38 = vadd.f32 %v2411_v5, %v2123_v54  ;;  %v2413_v11 = vpop.f32.mrb[157].mxu0 }
 0x308   :  { %v2414_v32 = vpop.f32.mrb[158].mxu0 }
 0x309   :  { %v2415_v36 = vadd.f32 %v2414_v32, %v2126_v45  ;;  %v2416_v43 = vpop.f32.mrb[159].mxu0  ;;  %v2528_v53 = vmax.f32 %v2412_v38, 0.0 }
 0x30b   :  { %v2529_v17 = vmax.f32 %v2415_v36, 0.0 }
 0x30d   :  { %v4376_v60 = vpack.c.bf16 %v2529_v17, %v2528_v53 }
 0x30e   :  { %v2419_v25 = vpop.f32.mrb[160].mxu0  ;;  %v2427_v42 = vpop.f32.mrb[100].mxu1 }
 0x30f   :  { %v2420_v10 = vadd.f32 %v2419_v25, %v2131_v56  ;;  %v3299_v23 = vadd.f32 %v2427_v42, %v4287_v57  ;;  %v2421_v1 = vpop.f32.mrb[161].mxu0  ;;  %v2429_v21 = vpop.f32.mrb[101].mxu1 }
 0x310   :  { %v2422_v20 = vpop.f32.mrb[162].mxu0  ;;  %v2430_v30 = vpop.f32.mrb[102].mxu1 }
 0x311   :  { %v2423_v22 = vadd.f32 %v2422_v20, %v2134_v3  ;;  %v3300_v16 = vadd.f32 %v2430_v30, %v4289_v44  ;;  %v2432_v39 = vpop.f32.mrb[103].mxu1  ;;  %v2424_v19 = vpop.f32.mrb[163].mxu0  ;;  %v2530_v27 = vmax.f32 %v2420_v10, 0.0  ;;  %v2532_v6 = vmax.f32 %v3299_v23, 0.0 }
 0x312   :  { %v1262_v19 = vpop.permute.xlu1 %1261 }
 0x313   :  { %v2531_v2 = vmax.f32 %v2423_v22, 0.0  ;;  %v2533_v13 = vmax.f32 %v3300_v16, 0.0  ;;  %v1257_v22 = vpop.permute.xlu0 %1256 }
 0x315   :  { %v3135_v12 = vpack.c.bf16 %v2531_v2, %v2530_v27  ;;  %v3139_v50 = vpack.c.bf16 %v2533_v13, %v2532_v6 }
 0x316   :  { %v2435_v34 = vpop.f32.mrb[104].mxu1 }
 0x317   :  { %v3301_v55 = vadd.f32 %v2435_v34, %v4310_v18  ;;  %v2437_v52 = vpop.f32.mrb[105].mxu1  ;;  %3136 = vmatprep.subr.bf16.mxu0 %v3135_v12 }
 0x318   :  { %v2438_v57 = vpop.f32.mrb[106].mxu1  ;;  %3138 = vmatpush3.bf16.msra.mxu0 %v4330_v35 }
 0x319   :  { %v3302_v15 = vadd.f32 %v2438_v57, %v4312_v26  ;;  %v2440_v28 = vpop.f32.mrb[107].mxu1  ;;  %3140 = vmatprep.subr.bf16.mxu0 %v3139_v50  ;;  %v2534_v44 = vmax.f32 %v3301_v55, 0.0  ;;  %v2551_v50 = vpop.permute.xlu0 %2550 }
 0x31a   :  { %v2556_v52 = vrot.slane %v2551_v50, %v2555_v24 }
 0x31b   :  { %v2535_v47 = vmax.f32 %v3302_v15, 0.0 }
 0x31c   :  { %3142 = vmatpush3.bf16.msra.mxu0 %v4339_v40 }
 0x31d   :  { %v3143_v63 = vpack.c.bf16 %v2535_v47, %v2534_v44 }
 0x31e   :  { %v2443_v7 = vpop.f32.mrb[108].mxu1 }
 0x31f   :  { %v3303_v51 = vadd.f32 %v2443_v7, %v4334_v31  ;;  %v2445_v33 = vpop.f32.mrb[109].mxu1  ;;  %3144 = vmatprep.subr.bf16.mxu0 %v3143_v63 }
 0x320   :  { %v2446_v18 = vpop.f32.mrb[110].mxu1  ;;  %3146 = vmatpush3.bf16.msra.mxu0 %v4343_v9 }
 0x321   :  { %v3304_v54 = vadd.f32 %v2446_v18, %v4336_v46  ;;  %v2448_v35 = vpop.f32.mrb[111].mxu1  ;;  %v2536_v61 = vmax.f32 %v3303_v51, 0.0 }
 0x323   :  { %v2537_v26 = vmax.f32 %v3304_v54, 0.0 }
 0x325   :  { %v3147_v5 = vpack.c.bf16 %v2537_v26, %v2536_v61 }
 0x326   :  { %v2451_v45 = vpop.f32.mrb[112].mxu1 }
 0x327   :  { %v3305_v38 = vadd.f32 %v2451_v45, %v4345_v48  ;;  %v2453_v11 = vpop.f32.mrb[113].mxu1  ;;  %3148 = vmatprep.subr.bf16.mxu0 %v3147_v5 }
 0x328   :  { %v2454_v40 = vpop.f32.mrb[114].mxu1  ;;  %3150 = vmatpush3.bf16.msra.mxu0 %v4351_v4 }
 0x329   :  { %v3306_v31 = vadd.f32 %v2454_v40, %v4348_v14  ;;  %v2456_v32 = vpop.f32.mrb[115].mxu1  ;;  %v2538_v36 = vmax.f32 %v3305_v38, 0.0 }
 0x32b   :  { %v2539_v43 = vmax.f32 %v3306_v31, 0.0 }
 0x32d   :  { %v3151_v9 = vpack.c.bf16 %v2539_v43, %v2538_v36 }
 0x32e   :  { %v2459_v53 = vpop.f32.mrb[116].mxu1 }
 0x32f   :  { %v3307_v46 = vadd.f32 %v2459_v53, %v4354_v59  ;;  %v2461_v17 = vpop.f32.mrb[117].mxu1  ;;  %3152 = vmatprep.subr.bf16.mxu0 %v3151_v9 }
 0x330   :  { %v2462_v56 = vpop.f32.mrb[118].mxu1  ;;  %3154 = vmatpush3.bf16.msra.mxu0 %v4359_v49 }
 0x331   :  { %v3308_v48 = vadd.f32 %v2462_v56, %v4356_v29  ;;  %v2464_v25 = vpop.f32.mrb[119].mxu1  ;;  %v2540_v42 = vmax.f32 %v3307_v46, 0.0 }
 0x333   :  { %v2541_v3 = vmax.f32 %v3308_v48, 0.0 }
 0x335   :  { %v3155_v4 = vpack.c.bf16 %v2541_v3, %v2540_v42 }
 0x336   :  { %v2467_v10 = vpop.f32.mrb[120].mxu1 }
 0x337   :  { %v3309_v14 = vadd.f32 %v2467_v10, %v4365_v8  ;;  %v2469_v23 = vpop.f32.mrb[121].mxu1  ;;  %3156 = vmatprep.subr.bf16.mxu0 %v3155_v4 }
 0x338   :  { %v2470_v1 = vpop.f32.mrb[122].mxu1  ;;  %3158 = vmatpush3.bf16.msra.mxu0 %v4363_v0  ;;  %v2568_v0 = vsub.s32 2, %v4119_v58 }
 0x339   :  { %v3310_v59 = vadd.f32 %v2470_v1, %v4368_v41  ;;  %v2472_v21 = vpop.f32.mrb[123].mxu1  ;;  %v2542_v20 = vmax.f32 %v3309_v14, 0.0 }
 0x33a   :  { %v2569_v12 = vrot.slane %v4130_v62, %v2568_v0 }
 0x33b   :  { %v2543_v30 = vmax.f32 %v3310_v59, 0.0 }
 0x33d   :  { %v3159_v49 = vpack.c.bf16 %v2543_v30, %v2542_v20 }
 0x33e   :  { %v2475_v29 = vpop.f32.mrb[124].mxu1 }
 0x33f   :  { %v3311_v16 = vadd.f32 %v2475_v29, %v1257_v22  ;;  %v2477_v39 = vpop.f32.mrb[125].mxu1  ;;  %3160 = vmatprep.subr.bf16.mxu0 %v3159_v49 }
 0x340   :  { %v2478_v27 = vpop.f32.mrb[126].mxu1  ;;  %3162 = vmatpush3.bf16.msra.mxu0 %v4371_v37 }
 0x341   :  { %v3312_v8 = vadd.f32 %v2478_v27, %v1262_v19  ;;  %v2480_v6 = vpop.f32.mrb[127].mxu1  ;;  %v2544_v2 = vmax.f32 %v3311_v16, 0.0 }
 0x343   :  { %v2545_v13 = vmax.f32 %v3312_v8, 0.0 }
 0x345   :  { %v3163_v41 = vpack.c.bf16 %v2545_v13, %v2544_v2 }
 0x347   :  { %3164 = vmatprep.subr.bf16.mxu0 %v3163_v41 }
 0x348   :  { %3166 = vmatpush3.bf16.msra.mxu0 %v4376_v60 }
 0x34b   :  { %2713 = vmatmul.mubr.f32.vlgmr.msra.gmra.mrb[166].mxu0 %v2569_v12 }
 0x3a6   :  { %v2999_v34 = vpop.f32.mrb[164].mxu0 }
 0x3a7   :  { %v3000_v55 = vpop.f32.mrb[165].mxu0 }
 0x3a8   :  { %v3001_v37 = vadd.f32 %v3000_v55, %v2999_v34 }
 0x3aa   :  { %v2645_v57 = vadd.f32 %v3001_v37, %v2556_v52 }
 0x41e   :  { %v3034_v15 = vpop.f32.mrb[166].mxu0 }
 0x41f   :  { %v3035_v28 = vpop.f32.mrb[167].mxu0 }
 0x420   :  { %v3036_v44 = vadd.f32 %v3035_v28, %v3034_v15 }
 0x422   :  { %v2715_v47 = vadd.f32 %v3036_v44, %v2645_v57 }
 0x424   :  { %v2933_v63 = vmul.f32 -1.442695, %v2715_v47 }
 0x426   :  { %3573 = vpow2.f32 %v2933_v63 }
 0x430   :  { %v3574_v7 = vpop.eup %3573 }
 0x431   :  { %v2721_v51 = vadd.f32 1.0, %v3574_v7 }
 0x433   :  { %3575 = vrcp.f32 %v2721_v51 }
 0x43d   :  { %v3576_v62 = vpop.eup %3575 }
 0x43e   :  { %2725 = vst.msk [vmem:[#allocation6] sm:$0x1] %vm2724_vm1, %v3576_v62 }
 0x43f   :  { %3610 = shalt.err (!%p3607_p12)
}
 0x440   :  { %s3611_s17 = scalar_lea.hbm %s4422_s6, 16 }
 0x441   :  { %p3612_p13 = scmp.ne.s32.totalorder %s4422_s6, %s3611_s17  ;;  %p3615_p0 = scmp.lt.u32.totalorder %s3611_s17, %s4422_s6 }
 0x443   :  { %p3617_p1 = pnand %p3615_p0, %p3612_p13 }
 0x445   :  { %3620 = shalt.err (!%p3617_p1)
}
 0x446   :  { %2735 = dma.vmem_to_hbm [thread:$0]  %s2733_s13, 16, %s4422_s6, [#allocation5]  }
 0x447   :  { %3623 = dma.done.wait [#allocation5], 16  }
 0x448   :  { %3624 = vsyncadd [#allocation5], 4294967280 }
 0x449   :  { %2739 = vsyncpa [#allocation4], 1 }
 0x44a   :  { %2740 = vsyncpa [#allocation5], 1 }

</bundles_post_ra>
